<compile_context>
chip_gen: v6e
topology: v6e:2x2x1
jax: 0.10.0
libtpu: 0.0.40
codegen_flags: <defaults>
</compile_context>

<pallas_src>
import functools

import jax
import jax.numpy as jnp
from jax.experimental import pallas as pl
from jax.experimental.pallas import tpu as pltpu

ALPHA = 0.8  # MaskUpdate alpha


def _round_up(x, m):
    return (x + m - 1) // m * m


def _fwd_attn_kernel(params_ref,                 # SMEM (4,): [a, mu, gamma_l, gamma_r]
                     x_ref, m_ref,               # (Cin_p, FL), (Cm_p, FL) bf16, resident per batch
                     wx_ref, wm_ref,             # (K*K, Cout_p, Cin_p), (K*K, Cout_p, Cm_p) bf16
                     feat_ref, omask_ref, cfeat_ref, gmask_ref,   # (Cout_p, tl) f32 each
                     *, offsets, tl, halo):
    i = pl.program_id(1)
    base = pl.multiple_of(i * tl, 128)

    # One 128-aligned dynamic load of the halo'd slab; the K*K shifted patches
    # are then cheap static lane slices (VMEM-only, no HBM re-read).
    xs = x_ref[:, pl.ds(base, tl + halo)]        # (Cin_p, tl + halo) bf16
    ms = m_ref[:, pl.ds(base, tl + halo)]        # (Cm_p,  tl + halo) bf16

    cf = jnp.zeros(feat_ref.shape, jnp.float32)  # conv_features accumulator
    cm = jnp.zeros(feat_ref.shape, jnp.float32)  # conv_masks accumulator
    # Fused im2col: K*K shifted matmuls, bf16 operands, f32 accumulation.
    for kk, off in enumerate(offsets):
        cf = cf + jnp.dot(wx_ref[kk], xs[:, off:off + tl],
                          preferred_element_type=jnp.float32)
        cm = cm + jnp.dot(wm_ref[kk], ms[:, off:off + tl],
                          preferred_element_type=jnp.float32)

    a = params_ref[0]
    mu = params_ref[1]
    gamma_l = params_ref[2]
    gamma_r = params_ref[3]

    # GaussianActivation with a single exp (gamma selected per-branch).
    is_left = cm < mu
    d2 = (cm - mu) ** 2
    gamma_sel = jnp.where(is_left, gamma_l, gamma_r)
    e = jnp.exp(-gamma_sel * d2)
    g = jnp.where(is_left, a * e, 1.0 + (a - 1.0) * e)

    feat_ref[...] = cf * g                                    # output_features
    # MaskUpdate: relu(cm)**alpha, guarded so the cm<=0 branch never sees log(0).
    omask_ref[...] = jnp.where(cm > 0.0,
                               jnp.power(jnp.maximum(cm, 1e-30), ALPHA), 0.0)
    cfeat_ref[...] = cf                                       # conv_features
    gmask_ref[...] = g                                        # gaussian_masks


def _flat_padded(x, padding, fl_total, c_pad, dtype):
    """(N, C, H, W) -> (N, c_pad, fl_total): zero-pad channels + spatial, flatten."""
    n, c, h, w = x.shape
    xp = jnp.pad(x, ((0, 0), (0, c_pad - c), (padding, padding), (padding, padding)))
    xf = xp.reshape(n, c_pad, -1)
    return jnp.pad(xf, ((0, 0), (0, 0), (0, fl_total - xf.shape[-1]))).astype(dtype)


def _kk_weights(w, cout_p, cin_p, dtype):
    """(Cout, Cin, K, K) -> (K*K, Cout_p, Cin_p), ordered ky-major / kx-minor."""
    cout, cin, kh, kw = w.shape
    wk = jnp.transpose(w, (2, 3, 0, 1)).reshape(kh * kw, cout, cin)
    wk = jnp.pad(wk, ((0, 0), (0, cout_p - cout), (0, cin_p - cin)))
    return wk.astype(dtype)


@functools.partial(jax.jit, static_argnames=("kernel_size", "stride", "padding", "tile_m"))
def forward_attention_layer(input_features, input_masks, conv_w, mask_conv_w,
                            a, mu, gamma_l, gamma_r,
                            *, kernel_size, stride, padding, tile_m=1024):
    """Pallas implementation of ForwardAttentionLayer.forward (NCHW in / NCHW out)."""
    n, cin, h, w = input_features.shape
    cm_ch = input_masks.shape[1]
    cout = conv_w.shape[0]
    k = kernel_size

    # Stride-1 geometry (stride>1 is an exact subsample of the stride-1 conv).
    wp = w + 2 * padding
    hp = h + 2 * padding
    oh1 = hp - k + 1
    ow1 = wp - k + 1
    ohw_wide = oh1 * wp             # "wide" flat output (row stride = padded input row stride)

    cout_p = _round_up(cout, 8)
    cin_p = _round_up(cin, 8)
    cm_p = _round_up(cm_ch, 8)

    halo = _round_up((k - 1) * (wp + 1), 128)   # extra lanes needed by the shifted views

    # --- VMEM-aware tile sizing: clamp the TILE, not the limit ------------------
    try:
        vmem_cap = int(getattr(pltpu.get_tpu_info(), "vmem_capacity_bytes",
                               64 * 1024 * 1024))
    except Exception:
        vmem_cap = 64 * 1024 * 1024             # v7x-safe default
    budget = int(0.70 * vmem_cap)
    # resident double-buffered bf16 inputs + weights + slack
    fixed = (2 * 2 * (cin_p + cm_p) * (ohw_wide + 2 * halo) * 2
             + 2 * 2 * k * k * cout_p * (cin_p + cm_p) * 2 + (1 << 20))
    # per output lane: 4 f32 outputs double-buffered + accumulators/temps + slab slices
    per_lane = 2 * 4 * cout_p * 4 + 8 * cout_p * 4 + 3 * (cin_p + cm_p) * 2

    tl = _round_up(max(int(tile_m), 128), 128)
    tl = min(tl, _round_up(ohw_wide, 128))
    if budget > fixed + 128 * per_lane:
        tl = min(tl, max(128, (budget - fixed) // per_lane // 128 * 128))
    else:
        tl = 128   # TODO(synk): huge images need a manual halo'd-slab DMA path.
    # Guarantee >= 2 parallel grid steps so v7x's second TensorCore isn't idle.
    if n * pl.cdiv(ohw_wide, tl) < 2 and ohw_wide > 128:
        tl = max(128, _round_up(pl.cdiv(ohw_wide, 2), 128))

    ohw_pad = _round_up(ohw_wide, tl)
    n_tiles = ohw_pad // tl
    fl_total = _round_up(ohw_pad + halo, 128)

    # bf16 input stream + weights (f32 accumulation inside the kernel).
    xf = _flat_padded(input_features, padding, fl_total, cin_p, jnp.bfloat16)
    mf = _flat_padded(input_masks, padding, fl_total, cm_p, jnp.bfloat16)
    wxk = _kk_weights(conv_w, cout_p, cin_p, jnp.bfloat16)
    wmk = _kk_weights(mask_conv_w, cout_p, cm_p, jnp.bfloat16)

    # GaussianActivation parameter clamps (matches torch.clamp in forward).
    params = jnp.stack([
        jnp.clip(jnp.asarray(a, jnp.float32), 1.01, 6.0),
        jnp.clip(jnp.asarray(mu, jnp.float32), 0.1, 3.0),
        jnp.clip(jnp.asarray(gamma_l, jnp.float32), 0.5, 2.0),
        jnp.clip(jnp.asarray(gamma_r, jnp.float32), 0.5, 2.0),
    ])

    offsets = tuple(ky * wp + kx for ky in range(k) for kx in range(k))

    out_sds = jax.ShapeDtypeStruct((n, cout_p, ohw_pad), jnp.float32)
    out_spec = pl.BlockSpec((None, cout_p, tl), lambda b, i, prm: (b, 0, i))

    vmem_limit = min(int(0.9 * vmem_cap),
                     max(fixed + per_lane * tl + (4 << 20), 32 * 1024 * 1024))

    grid_spec = pltpu.PrefetchScalarGridSpec(
        num_scalar_prefetch=1,
        grid=(n, n_tiles),
        in_specs=[
            # whole padded image resident across the spatial axis (DMA'd once per b)
            pl.BlockSpec((None, cin_p, fl_total), lambda b, i, prm: (b, 0, 0)),
            pl.BlockSpec((None, cm_p, fl_total), lambda b, i, prm: (b, 0, 0)),
            pl.BlockSpec((k * k, cout_p, cin_p), lambda b, i, prm: (0, 0, 0)),
            pl.BlockSpec((k * k, cout_p, cm_p), lambda b, i, prm: (0, 0, 0)),
        ],
        out_specs=[out_spec, out_spec, out_spec, out_spec],
    )

    kern = functools.partial(_fwd_attn_kernel, offsets=offsets, tl=tl, halo=halo)

    feat, omask, cfeat, gmask = pl.pallas_call(
        kern,
        out_shape=(out_sds, out_sds, out_sds, out_sds),
        grid_spec=grid_spec,
        compiler_params=pltpu.CompilerParams(
            dimension_semantics=("parallel", "parallel"),
            vmem_limit_bytes=vmem_limit),
    )(params, xf, mf, wxk, wmk)

    def to_nchw(y):
        # Drop padded channels / padded lanes, then the (small) wide-column overhead.
        y = y[:, :cout, :ohw_wide].reshape(n, cout, oh1, wp)[:, :, :, :ow1]
        if stride > 1:
            y = y[:, :, ::stride, ::stride]     # exact: strided conv = stride-1 conv subsampled
        return y

    return to_nchw(feat), to_nchw(omask), to_nchw(cfeat), to_nchw(gmask)


def _reference(input_features, input_masks, conv_w, mask_conv_w,
               a, mu, gamma_l, gamma_r, *, stride, padding):
    """Pure-JAX f32 reference for correctness checking."""
    dn = jax.lax.conv_dimension_numbers(input_features.shape, conv_w.shape,
                                        ("NCHW", "OIHW", "NCHW"))
    cf = jax.lax.conv_general_dilated(input_features, conv_w, (stride, stride),
                                      [(padding, padding)] * 2, dimension_numbers=dn)
    dn2 = jax.lax.conv_dimension_numbers(input_masks.shape, mask_conv_w.shape,
                                         ("NCHW", "OIHW", "NCHW"))
    cm = jax.lax.conv_general_dilated(input_masks, mask_conv_w, (stride, stride),
                                      [(padding, padding)] * 2, dimension_numbers=dn2)
    a = jnp.clip(a, 1.01, 6.0); mu = jnp.clip(mu, 0.1, 3.0)
    gl = jnp.clip(gamma_l, 0.5, 2.0); gr = jnp.clip(gamma_r, 0.5, 2.0)
    d2 = (cm - mu) ** 2
    g = jnp.where(cm < mu, a * jnp.exp(-gl * d2), 1.0 + (a - 1.0) * jnp.exp(-gr * d2))
    return cf * g, jnp.power(jnp.maximum(cm, 0.0), ALPHA), cf, g


if __name__ == "__main__":
    key = jax.random.PRNGKey(0)
    k_x, k_m, k_wc, k_wm = jax.random.split(key, 4)

    # Module config: in_channels=4 -> mask_conv takes 3 channels; bias=False.
    N, CIN, H, W = 2, 4, 16, 16
    COUT, K, STRIDE, PAD = 8, 3, 1, 1
    CM = 3 if CIN == 4 else CIN

    input_features = jax.random.normal(k_x, (N, CIN, H, W), dtype=jnp.float32)
    input_masks = jax.random.uniform(k_m, (N, CM, H, W), dtype=jnp.float32)

    # weights_init('gaussian'): N(0, 0.02).
    conv_w = 0.02 * jax.random.normal(k_wc, (COUT, CIN, K, K), dtype=jnp.float32)
    mask_conv_w = 0.02 * jax.random.normal(k_wm, (COUT, CM, K, K), dtype=jnp.float32)

    # GaussianActivation init values.
    a, mu, gamma_l, gamma_r = 1.1, 2.0, 1.0, 1.0

    outs = forward_attention_layer(
        input_features, input_masks, conv_w, mask_conv_w,
        a, mu, gamma_l, gamma_r,
        kernel_size=K, stride=STRIDE, padding=PAD)
    outs = jax.block_until_ready(outs)

    refs = _reference(input_features, input_masks, conv_w, mask_conv_w,
                      jnp.float32(a), jnp.float32(mu),
                      jnp.float32(gamma_l), jnp.float32(gamma_r),
                      stride=STRIDE, padding=PAD)

    names = ("output_features", "output_masks", "conv_features", "gaussian_masks")
    for name, o, r in zip(names, outs, refs):
        assert o.shape == r.shape, (name, o.shape, r.shape)
        # bf16 matmul operands (f32 accumulate) -> slightly looser tolerance.
        assert jnp.allclose(o, r, atol=2e-2, rtol=2e-2), name

    print("KERNEL_OK")
</pallas_src>

<mosaic_0001>
module attributes {stable_mosaic.version = 11 : i64} {
  func.func @_fwd_attn_kernel(%arg0: i32, %arg1: i32, %arg2: memref<4xf32, #tpu.memory_space<smem>>, %arg3: memref<1x8x512xbf16, #tpu.memory_space<vmem>>, %arg4: memref<1x8x512xbf16, #tpu.memory_space<vmem>>, %arg5: memref<9x8x8xbf16, #tpu.memory_space<vmem>>, %arg6: memref<9x8x8xbf16, #tpu.memory_space<vmem>>, %arg7: memref<1x8x384xf32, #tpu.memory_space<vmem>>, %arg8: memref<1x8x384xf32, #tpu.memory_space<vmem>>, %arg9: memref<1x8x384xf32, #tpu.memory_space<vmem>>, %arg10: memref<1x8x384xf32, #tpu.memory_space<vmem>>) attributes {dimension_semantics = [#tpu.dimension_semantics<parallel>, #tpu.dimension_semantics<parallel>], iteration_bounds = array<i64: 2, 1>, scalar_prefetch = 1 : i64, scratch_operands = 0 : i64, tpu.core_type = #tpu.core_type<tc>, window_params = [{transform_indices = @transform_0, window_bounds = array<i64: 1, 8, 512>}, {transform_indices = @transform_1, window_bounds = array<i64: 1, 8, 512>}, {pipeline_mode = #tpu.pipeline_mode<synchronous>, transform_indices = @transform_2, window_bounds = array<i64: 9, 8, 8>}, {pipeline_mode = #tpu.pipeline_mode<synchronous>, transform_indices = @transform_3, window_bounds = array<i64: 9, 8, 8>}, {transform_indices = @transform_4, window_bounds = array<i64: 1, 8, 384>}, {transform_indices = @transform_5, window_bounds = array<i64: 1, 8, 384>}, {transform_indices = @transform_6, window_bounds = array<i64: 1, 8, 384>}, {transform_indices = @transform_7, window_bounds = array<i64: 1, 8, 384>}]} {
    %c384_i32 = arith.constant 384 : i32
    %0 = arith.muli %arg1, %c384_i32 : i32
    %1 = tpu.assume_multiple %0, 128 : i32
    %c0 = arith.constant 0 : index
    %c0_0 = arith.constant 0 : index
    %2 = arith.index_cast %1 : i32 to index
    %3 = vector.load %arg3[%c0, %c0_0, %2] : memref<1x8x512xbf16, #tpu.memory_space<vmem>>, vector<1x8x512xbf16>
    %4 = vector.shape_cast %3 : vector<1x8x512xbf16> to vector<8x512xbf16>
    %c0_1 = arith.constant 0 : index
    %c0_2 = arith.constant 0 : index
    %5 = arith.index_cast %1 : i32 to index
    %6 = vector.load %arg4[%c0_1, %c0_2, %5] : memref<1x8x512xbf16, #tpu.memory_space<vmem>>, vector<1x8x512xbf16>
    %7 = vector.shape_cast %6 : vector<1x8x512xbf16> to vector<8x512xbf16>
    %cst = arith.constant 0.000000e+00 : f32
    %8 = vector.broadcast %cst : f32 to vector<8x384xf32>
    %cst_3 = arith.constant 0.000000e+00 : f32
    %9 = vector.broadcast %cst_3 : f32 to vector<8x384xf32>
    %c0_4 = arith.constant 0 : index
    %c0_5 = arith.constant 0 : index
    %c0_6 = arith.constant 0 : index
    %10 = vector.load %arg5[%c0_4, %c0_5, %c0_6] : memref<9x8x8xbf16, #tpu.memory_space<vmem>>, vector<1x8x8xbf16>
    %11 = vector.shape_cast %10 : vector<1x8x8xbf16> to vector<8x8xbf16>
    %12 = vector.extract_strided_slice %4 {offsets = [0, 0], sizes = [8, 384], strides = [1, 1]} : vector<8x512xbf16> to vector<8x384xbf16>
    %cst_7 = arith.constant dense<0.000000e+00> : vector<8x384xf32>
    %13 = tpu.matmul %11, %12, %cst_7 {dimension_numbers = #tpu.dot_dimension_numbers<[1], [0], [0], [1], [0, 0, 1, 1], [], []>} : vector<8x8xbf16>, vector<8x384xbf16>, vector<8x384xf32> -> vector<8x384xf32>
    %14 = arith.addf %8, %13 : vector<8x384xf32>
    %c0_8 = arith.constant 0 : index
    %c0_9 = arith.constant 0 : index
    %c0_10 = arith.constant 0 : index
    %15 = vector.load %arg6[%c0_8, %c0_9, %c0_10] : memref<9x8x8xbf16, #tpu.memory_space<vmem>>, vector<1x8x8xbf16>
    %16 = vector.shape_cast %15 : vector<1x8x8xbf16> to vector<8x8xbf16>
    %17 = vector.extract_strided_slice %7 {offsets = [0, 0], sizes = [8, 384], strides = [1, 1]} : vector<8x512xbf16> to vector<8x384xbf16>
    %cst_11 = arith.constant dense<0.000000e+00> : vector<8x384xf32>
    %18 = tpu.matmul %16, %17, %cst_11 {dimension_numbers = #tpu.dot_dimension_numbers<[1], [0], [0], [1], [0, 0, 1, 1], [], []>} : vector<8x8xbf16>, vector<8x384xbf16>, vector<8x384xf32> -> vector<8x384xf32>
    %19 = arith.addf %9, %18 : vector<8x384xf32>
    %c1 = arith.constant 1 : index
    %c0_12 = arith.constant 0 : index
    %c0_13 = arith.constant 0 : index
    %20 = vector.load %arg5[%c1, %c0_12, %c0_13] : memref<9x8x8xbf16, #tpu.memory_space<vmem>>, vector<1x8x8xbf16>
    %21 = vector.shape_cast %20 : vector<1x8x8xbf16> to vector<8x8xbf16>
    %22 = vector.extract_strided_slice %4 {offsets = [0, 1], sizes = [8, 384], strides = [1, 1]} : vector<8x512xbf16> to vector<8x384xbf16>
    %cst_14 = arith.constant dense<0.000000e+00> : vector<8x384xf32>
    %23 = tpu.matmul %21, %22, %cst_14 {dimension_numbers = #tpu.dot_dimension_numbers<[1], [0], [0], [1], [0, 0, 1, 1], [], []>} : vector<8x8xbf16>, vector<8x384xbf16>, vector<8x384xf32> -> vector<8x384xf32>
    %24 = arith.addf %14, %23 : vector<8x384xf32>
    %c1_15 = arith.constant 1 : index
    %c0_16 = arith.constant 0 : index
    %c0_17 = arith.constant 0 : index
    %25 = vector.load %arg6[%c1_15, %c0_16, %c0_17] : memref<9x8x8xbf16, #tpu.memory_space<vmem>>, vector<1x8x8xbf16>
    %26 = vector.shape_cast %25 : vector<1x8x8xbf16> to vector<8x8xbf16>
    %27 = vector.extract_strided_slice %7 {offsets = [0, 1], sizes = [8, 384], strides = [1, 1]} : vector<8x512xbf16> to vector<8x384xbf16>
    %cst_18 = arith.constant dense<0.000000e+00> : vector<8x384xf32>
    %28 = tpu.matmul %26, %27, %cst_18 {dimension_numbers = #tpu.dot_dimension_numbers<[1], [0], [0], [1], [0, 0, 1, 1], [], []>} : vector<8x8xbf16>, vector<8x384xbf16>, vector<8x384xf32> -> vector<8x384xf32>
    %29 = arith.addf %19, %28 : vector<8x384xf32>
    %c2 = arith.constant 2 : index
    %c0_19 = arith.constant 0 : index
    %c0_20 = arith.constant 0 : index
    %30 = vector.load %arg5[%c2, %c0_19, %c0_20] : memref<9x8x8xbf16, #tpu.memory_space<vmem>>, vector<1x8x8xbf16>
    %31 = vector.shape_cast %30 : vector<1x8x8xbf16> to vector<8x8xbf16>
    %32 = vector.extract_strided_slice %4 {offsets = [0, 2], sizes = [8, 384], strides = [1, 1]} : vector<8x512xbf16> to vector<8x384xbf16>
    %cst_21 = arith.constant dense<0.000000e+00> : vector<8x384xf32>
    %33 = tpu.matmul %31, %32, %cst_21 {dimension_numbers = #tpu.dot_dimension_numbers<[1], [0], [0], [1], [0, 0, 1, 1], [], []>} : vector<8x8xbf16>, vector<8x384xbf16>, vector<8x384xf32> -> vector<8x384xf32>
    %34 = arith.addf %24, %33 : vector<8x384xf32>
    %c2_22 = arith.constant 2 : index
    %c0_23 = arith.constant 0 : index
    %c0_24 = arith.constant 0 : index
    %35 = vector.load %arg6[%c2_22, %c0_23, %c0_24] : memref<9x8x8xbf16, #tpu.memory_space<vmem>>, vector<1x8x8xbf16>
    %36 = vector.shape_cast %35 : vector<1x8x8xbf16> to vector<8x8xbf16>
    %37 = vector.extract_strided_slice %7 {offsets = [0, 2], sizes = [8, 384], strides = [1, 1]} : vector<8x512xbf16> to vector<8x384xbf16>
    %cst_25 = arith.constant dense<0.000000e+00> : vector<8x384xf32>
    %38 = tpu.matmul %36, %37, %cst_25 {dimension_numbers = #tpu.dot_dimension_numbers<[1], [0], [0], [1], [0, 0, 1, 1], [], []>} : vector<8x8xbf16>, vector<8x384xbf16>, vector<8x384xf32> -> vector<8x384xf32>
    %39 = arith.addf %29, %38 : vector<8x384xf32>
    %c3 = arith.constant 3 : index
    %c0_26 = arith.constant 0 : index
    %c0_27 = arith.constant 0 : index
    %40 = vector.load %arg5[%c3, %c0_26, %c0_27] : memref<9x8x8xbf16, #tpu.memory_space<vmem>>, vector<1x8x8xbf16>
    %41 = vector.shape_cast %40 : vector<1x8x8xbf16> to vector<8x8xbf16>
    %42 = vector.extract_strided_slice %4 {offsets = [0, 18], sizes = [8, 384], strides = [1, 1]} : vector<8x512xbf16> to vector<8x384xbf16>
    %cst_28 = arith.constant dense<0.000000e+00> : vector<8x384xf32>
    %43 = tpu.matmul %41, %42, %cst_28 {dimension_numbers = #tpu.dot_dimension_numbers<[1], [0], [0], [1], [0, 0, 1, 1], [], []>} : vector<8x8xbf16>, vector<8x384xbf16>, vector<8x384xf32> -> vector<8x384xf32>
    %44 = arith.addf %34, %43 : vector<8x384xf32>
    %c3_29 = arith.constant 3 : index
    %c0_30 = arith.constant 0 : index
    %c0_31 = arith.constant 0 : index
    %45 = vector.load %arg6[%c3_29, %c0_30, %c0_31] : memref<9x8x8xbf16, #tpu.memory_space<vmem>>, vector<1x8x8xbf16>
    %46 = vector.shape_cast %45 : vector<1x8x8xbf16> to vector<8x8xbf16>
    %47 = vector.extract_strided_slice %7 {offsets = [0, 18], sizes = [8, 384], strides = [1, 1]} : vector<8x512xbf16> to vector<8x384xbf16>
    %cst_32 = arith.constant dense<0.000000e+00> : vector<8x384xf32>
    %48 = tpu.matmul %46, %47, %cst_32 {dimension_numbers = #tpu.dot_dimension_numbers<[1], [0], [0], [1], [0, 0, 1, 1], [], []>} : vector<8x8xbf16>, vector<8x384xbf16>, vector<8x384xf32> -> vector<8x384xf32>
    %49 = arith.addf %39, %48 : vector<8x384xf32>
    %c4 = arith.constant 4 : index
    %c0_33 = arith.constant 0 : index
    %c0_34 = arith.constant 0 : index
    %50 = vector.load %arg5[%c4, %c0_33, %c0_34] : memref<9x8x8xbf16, #tpu.memory_space<vmem>>, vector<1x8x8xbf16>
    %51 = vector.shape_cast %50 : vector<1x8x8xbf16> to vector<8x8xbf16>
    %52 = vector.extract_strided_slice %4 {offsets = [0, 19], sizes = [8, 384], strides = [1, 1]} : vector<8x512xbf16> to vector<8x384xbf16>
    %cst_35 = arith.constant dense<0.000000e+00> : vector<8x384xf32>
    %53 = tpu.matmul %51, %52, %cst_35 {dimension_numbers = #tpu.dot_dimension_numbers<[1], [0], [0], [1], [0, 0, 1, 1], [], []>} : vector<8x8xbf16>, vector<8x384xbf16>, vector<8x384xf32> -> vector<8x384xf32>
    %54 = arith.addf %44, %53 : vector<8x384xf32>
    %c4_36 = arith.constant 4 : index
    %c0_37 = arith.constant 0 : index
    %c0_38 = arith.constant 0 : index
    %55 = vector.load %arg6[%c4_36, %c0_37, %c0_38] : memref<9x8x8xbf16, #tpu.memory_space<vmem>>, vector<1x8x8xbf16>
    %56 = vector.shape_cast %55 : vector<1x8x8xbf16> to vector<8x8xbf16>
    %57 = vector.extract_strided_slice %7 {offsets = [0, 19], sizes = [8, 384], strides = [1, 1]} : vector<8x512xbf16> to vector<8x384xbf16>
    %cst_39 = arith.constant dense<0.000000e+00> : vector<8x384xf32>
    %58 = tpu.matmul %56, %57, %cst_39 {dimension_numbers = #tpu.dot_dimension_numbers<[1], [0], [0], [1], [0, 0, 1, 1], [], []>} : vector<8x8xbf16>, vector<8x384xbf16>, vector<8x384xf32> -> vector<8x384xf32>
    %59 = arith.addf %49, %58 : vector<8x384xf32>
    %c5 = arith.constant 5 : index
    %c0_40 = arith.constant 0 : index
    %c0_41 = arith.constant 0 : index
    %60 = vector.load %arg5[%c5, %c0_40, %c0_41] : memref<9x8x8xbf16, #tpu.memory_space<vmem>>, vector<1x8x8xbf16>
    %61 = vector.shape_cast %60 : vector<1x8x8xbf16> to vector<8x8xbf16>
    %62 = vector.extract_strided_slice %4 {offsets = [0, 20], sizes = [8, 384], strides = [1, 1]} : vector<8x512xbf16> to vector<8x384xbf16>
    %cst_42 = arith.constant dense<0.000000e+00> : vector<8x384xf32>
    %63 = tpu.matmul %61, %62, %cst_42 {dimension_numbers = #tpu.dot_dimension_numbers<[1], [0], [0], [1], [0, 0, 1, 1], [], []>} : vector<8x8xbf16>, vector<8x384xbf16>, vector<8x384xf32> -> vector<8x384xf32>
    %64 = arith.addf %54, %63 : vector<8x384xf32>
    %c5_43 = arith.constant 5 : index
    %c0_44 = arith.constant 0 : index
    %c0_45 = arith.constant 0 : index
    %65 = vector.load %arg6[%c5_43, %c0_44, %c0_45] : memref<9x8x8xbf16, #tpu.memory_space<vmem>>, vector<1x8x8xbf16>
    %66 = vector.shape_cast %65 : vector<1x8x8xbf16> to vector<8x8xbf16>
    %67 = vector.extract_strided_slice %7 {offsets = [0, 20], sizes = [8, 384], strides = [1, 1]} : vector<8x512xbf16> to vector<8x384xbf16>
    %cst_46 = arith.constant dense<0.000000e+00> : vector<8x384xf32>
    %68 = tpu.matmul %66, %67, %cst_46 {dimension_numbers = #tpu.dot_dimension_numbers<[1], [0], [0], [1], [0, 0, 1, 1], [], []>} : vector<8x8xbf16>, vector<8x384xbf16>, vector<8x384xf32> -> vector<8x384xf32>
    %69 = arith.addf %59, %68 : vector<8x384xf32>
    %c6 = arith.constant 6 : index
    %c0_47 = arith.constant 0 : index
    %c0_48 = arith.constant 0 : index
    %70 = vector.load %arg5[%c6, %c0_47, %c0_48] : memref<9x8x8xbf16, #tpu.memory_space<vmem>>, vector<1x8x8xbf16>
    %71 = vector.shape_cast %70 : vector<1x8x8xbf16> to vector<8x8xbf16>
    %72 = vector.extract_strided_slice %4 {offsets = [0, 36], sizes = [8, 384], strides = [1, 1]} : vector<8x512xbf16> to vector<8x384xbf16>
    %cst_49 = arith.constant dense<0.000000e+00> : vector<8x384xf32>
    %73 = tpu.matmul %71, %72, %cst_49 {dimension_numbers = #tpu.dot_dimension_numbers<[1], [0], [0], [1], [0, 0, 1, 1], [], []>} : vector<8x8xbf16>, vector<8x384xbf16>, vector<8x384xf32> -> vector<8x384xf32>
    %74 = arith.addf %64, %73 : vector<8x384xf32>
    %c6_50 = arith.constant 6 : index
    %c0_51 = arith.constant 0 : index
    %c0_52 = arith.constant 0 : index
    %75 = vector.load %arg6[%c6_50, %c0_51, %c0_52] : memref<9x8x8xbf16, #tpu.memory_space<vmem>>, vector<1x8x8xbf16>
    %76 = vector.shape_cast %75 : vector<1x8x8xbf16> to vector<8x8xbf16>
    %77 = vector.extract_strided_slice %7 {offsets = [0, 36], sizes = [8, 384], strides = [1, 1]} : vector<8x512xbf16> to vector<8x384xbf16>
    %cst_53 = arith.constant dense<0.000000e+00> : vector<8x384xf32>
    %78 = tpu.matmul %76, %77, %cst_53 {dimension_numbers = #tpu.dot_dimension_numbers<[1], [0], [0], [1], [0, 0, 1, 1], [], []>} : vector<8x8xbf16>, vector<8x384xbf16>, vector<8x384xf32> -> vector<8x384xf32>
    %79 = arith.addf %69, %78 : vector<8x384xf32>
    %c7 = arith.constant 7 : index
    %c0_54 = arith.constant 0 : index
    %c0_55 = arith.constant 0 : index
    %80 = vector.load %arg5[%c7, %c0_54, %c0_55] : memref<9x8x8xbf16, #tpu.memory_space<vmem>>, vector<1x8x8xbf16>
    %81 = vector.shape_cast %80 : vector<1x8x8xbf16> to vector<8x8xbf16>
    %82 = vector.extract_strided_slice %4 {offsets = [0, 37], sizes = [8, 384], strides = [1, 1]} : vector<8x512xbf16> to vector<8x384xbf16>
    %cst_56 = arith.constant dense<0.000000e+00> : vector<8x384xf32>
    %83 = tpu.matmul %81, %82, %cst_56 {dimension_numbers = #tpu.dot_dimension_numbers<[1], [0], [0], [1], [0, 0, 1, 1], [], []>} : vector<8x8xbf16>, vector<8x384xbf16>, vector<8x384xf32> -> vector<8x384xf32>
    %84 = arith.addf %74, %83 : vector<8x384xf32>
    %c7_57 = arith.constant 7 : index
    %c0_58 = arith.constant 0 : index
    %c0_59 = arith.constant 0 : index
    %85 = vector.load %arg6[%c7_57, %c0_58, %c0_59] : memref<9x8x8xbf16, #tpu.memory_space<vmem>>, vector<1x8x8xbf16>
    %86 = vector.shape_cast %85 : vector<1x8x8xbf16> to vector<8x8xbf16>
    %87 = vector.extract_strided_slice %7 {offsets = [0, 37], sizes = [8, 384], strides = [1, 1]} : vector<8x512xbf16> to vector<8x384xbf16>
    %cst_60 = arith.constant dense<0.000000e+00> : vector<8x384xf32>
    %88 = tpu.matmul %86, %87, %cst_60 {dimension_numbers = #tpu.dot_dimension_numbers<[1], [0], [0], [1], [0, 0, 1, 1], [], []>} : vector<8x8xbf16>, vector<8x384xbf16>, vector<8x384xf32> -> vector<8x384xf32>
    %89 = arith.addf %79, %88 : vector<8x384xf32>
    %c8 = arith.constant 8 : index
    %c0_61 = arith.constant 0 : index
    %c0_62 = arith.constant 0 : index
    %90 = vector.load %arg5[%c8, %c0_61, %c0_62] : memref<9x8x8xbf16, #tpu.memory_space<vmem>>, vector<1x8x8xbf16>
    %91 = vector.shape_cast %90 : vector<1x8x8xbf16> to vector<8x8xbf16>
    %92 = vector.extract_strided_slice %4 {offsets = [0, 38], sizes = [8, 384], strides = [1, 1]} : vector<8x512xbf16> to vector<8x384xbf16>
    %cst_63 = arith.constant dense<0.000000e+00> : vector<8x384xf32>
    %93 = tpu.matmul %91, %92, %cst_63 {dimension_numbers = #tpu.dot_dimension_numbers<[1], [0], [0], [1], [0, 0, 1, 1], [], []>} : vector<8x8xbf16>, vector<8x384xbf16>, vector<8x384xf32> -> vector<8x384xf32>
    %94 = arith.addf %84, %93 : vector<8x384xf32>
    %c8_64 = arith.constant 8 : index
    %c0_65 = arith.constant 0 : index
    %c0_66 = arith.constant 0 : index
    %95 = vector.load %arg6[%c8_64, %c0_65, %c0_66] : memref<9x8x8xbf16, #tpu.memory_space<vmem>>, vector<1x8x8xbf16>
    %96 = vector.shape_cast %95 : vector<1x8x8xbf16> to vector<8x8xbf16>
    %97 = vector.extract_strided_slice %7 {offsets = [0, 38], sizes = [8, 384], strides = [1, 1]} : vector<8x512xbf16> to vector<8x384xbf16>
    %cst_67 = arith.constant dense<0.000000e+00> : vector<8x384xf32>
    %98 = tpu.matmul %96, %97, %cst_67 {dimension_numbers = #tpu.dot_dimension_numbers<[1], [0], [0], [1], [0, 0, 1, 1], [], []>} : vector<8x8xbf16>, vector<8x384xbf16>, vector<8x384xf32> -> vector<8x384xf32>
    %99 = arith.addf %89, %98 : vector<8x384xf32>
    %c0_68 = arith.constant 0 : index
    %100 = memref.load %arg2[%c0_68] : memref<4xf32, #tpu.memory_space<smem>>
    %c1_69 = arith.constant 1 : index
    %101 = memref.load %arg2[%c1_69] : memref<4xf32, #tpu.memory_space<smem>>
    %c2_70 = arith.constant 2 : index
    %102 = memref.load %arg2[%c2_70] : memref<4xf32, #tpu.memory_space<smem>>
    %c3_71 = arith.constant 3 : index
    %103 = memref.load %arg2[%c3_71] : memref<4xf32, #tpu.memory_space<smem>>
    %104 = vector.broadcast %101 : f32 to vector<8x384xf32>
    %105 = arith.cmpf olt, %99, %104 : vector<8x384xf32>
    %106 = vector.broadcast %101 : f32 to vector<8x384xf32>
    %107 = arith.subf %99, %106 : vector<8x384xf32>
    %108 = arith.mulf %107, %107 : vector<8x384xf32>
    %109 = vector.broadcast %102 : f32 to vector<8x384xf32>
    %110 = vector.broadcast %103 : f32 to vector<8x384xf32>
    %111 = arith.select %105, %109, %110 : vector<8x384xi1>, vector<8x384xf32>
    %cst_72 = arith.constant 0.000000e+00 : f32
    %112 = vector.broadcast %cst_72 : f32 to vector<8x384xf32>
    %113 = arith.subf %112, %111 : vector<8x384xf32>
    %114 = arith.mulf %113, %108 : vector<8x384xf32>
    %115 = math.exp %114 : vector<8x384xf32>
    %116 = vector.broadcast %100 : f32 to vector<8x384xf32>
    %117 = arith.mulf %116, %115 : vector<8x384xf32>
    %cst_73 = arith.constant 1.000000e+00 : f32
    %118 = arith.subf %100, %cst_73 : f32
    %119 = vector.broadcast %118 : f32 to vector<8x384xf32>
    %120 = arith.mulf %119, %115 : vector<8x384xf32>
    %cst_74 = arith.constant 1.000000e+00 : f32
    %121 = vector.broadcast %cst_74 : f32 to vector<8x384xf32>
    %122 = arith.addf %121, %120 : vector<8x384xf32>
    %123 = arith.select %105, %117, %122 : vector<8x384xi1>, vector<8x384xf32>
    %124 = arith.mulf %94, %123 : vector<8x384xf32>
    %c0_75 = arith.constant 0 : index
    %c0_76 = arith.constant 0 : index
    %c0_77 = arith.constant 0 : index
    %125 = vector.load %arg7[%c0_75, %c0_76, %c0_77] : memref<1x8x384xf32, #tpu.memory_space<vmem>>, vector<1x8x384xf32>
    %126 = vector.shape_cast %125 : vector<1x8x384xf32> to vector<8x384xf32>
    %127 = vector.shape_cast %124 : vector<8x384xf32> to vector<1x8x384xf32>
    tpu.vector_store %arg7[%c0_75, %c0_76, %c0_77], %127 {strides = array<i32>} : memref<1x8x384xf32, #tpu.memory_space<vmem>>, vector<1x8x384xf32>,
    %cst_78 = arith.constant 0.000000e+00 : f32
    %128 = vector.broadcast %cst_78 : f32 to vector<8x384xf32>
    %129 = arith.cmpf ogt, %99, %128 : vector<8x384xf32>
    %cst_79 = arith.constant 1.000000e-30 : f32
    %130 = vector.broadcast %cst_79 : f32 to vector<8x384xf32>
    %131 = arith.maximumf %99, %130 : vector<8x384xf32>
    %cst_80 = arith.constant 8.000000e-01 : f32
    %132 = vector.broadcast %cst_80 : f32 to vector<8x384xf32>
    %133 = math.powf %131, %132 : vector<8x384xf32>
    %cst_81 = arith.constant 0.000000e+00 : f32
    %134 = vector.broadcast %cst_81 : f32 to vector<8x384xf32>
    %135 = arith.select %129, %133, %134 : vector<8x384xi1>, vector<8x384xf32>
    %c0_82 = arith.constant 0 : index
    %c0_83 = arith.constant 0 : index
    %c0_84 = arith.constant 0 : index
    %136 = vector.load %arg8[%c0_82, %c0_83, %c0_84] : memref<1x8x384xf32, #tpu.memory_space<vmem>>, vector<1x8x384xf32>
    %137 = vector.shape_cast %136 : vector<1x8x384xf32> to vector<8x384xf32>
    %138 = vector.shape_cast %135 : vector<8x384xf32> to vector<1x8x384xf32>
    tpu.vector_store %arg8[%c0_82, %c0_83, %c0_84], %138 {strides = array<i32>} : memref<1x8x384xf32, #tpu.memory_space<vmem>>, vector<1x8x384xf32>,
    %c0_85 = arith.constant 0 : index
    %c0_86 = arith.constant 0 : index
    %c0_87 = arith.constant 0 : index
    %139 = vector.load %arg9[%c0_85, %c0_86, %c0_87] : memref<1x8x384xf32, #tpu.memory_space<vmem>>, vector<1x8x384xf32>
    %140 = vector.shape_cast %139 : vector<1x8x384xf32> to vector<8x384xf32>
    %141 = vector.shape_cast %94 : vector<8x384xf32> to vector<1x8x384xf32>
    tpu.vector_store %arg9[%c0_85, %c0_86, %c0_87], %141 {strides = array<i32>} : memref<1x8x384xf32, #tpu.memory_space<vmem>>, vector<1x8x384xf32>,
    %c0_88 = arith.constant 0 : index
    %c0_89 = arith.constant 0 : index
    %c0_90 = arith.constant 0 : index
    %142 = vector.load %arg10[%c0_88, %c0_89, %c0_90] : memref<1x8x384xf32, #tpu.memory_space<vmem>>, vector<1x8x384xf32>
    %143 = vector.shape_cast %142 : vector<1x8x384xf32> to vector<8x384xf32>
    %144 = vector.shape_cast %123 : vector<8x384xf32> to vector<1x8x384xf32>
    tpu.vector_store %arg10[%c0_88, %c0_89, %c0_90], %144 {strides = array<i32>} : memref<1x8x384xf32, #tpu.memory_space<vmem>>, vector<1x8x384xf32>,
    return
  }
  func.func @transform_0(%arg0: i32, %arg1: i32, %arg2: memref<4xf32, #tpu.memory_space<smem>>) -> (i32, i32, i32) {
    %c0_i32 = arith.constant 0 : i32
    %c0_i32_0 = arith.constant 0 : i32
    %c0_i32_1 = arith.constant 0 : i32
    return %arg0, %c0_i32, %c0_i32_0 : i32, i32, i32
  }
  func.func @transform_1(%arg0: i32, %arg1: i32, %arg2: memref<4xf32, #tpu.memory_space<smem>>) -> (i32, i32, i32) {
    %c0_i32 = arith.constant 0 : i32
    %c0_i32_0 = arith.constant 0 : i32
    %c0_i32_1 = arith.constant 0 : i32
    return %arg0, %c0_i32, %c0_i32_0 : i32, i32, i32
  }
  func.func @transform_2(%arg0: i32, %arg1: i32, %arg2: memref<4xf32, #tpu.memory_space<smem>>) -> (i32, i32, i32) {
    %c0_i32 = arith.constant 0 : i32
    %c0_i32_0 = arith.constant 0 : i32
    %c0_i32_1 = arith.constant 0 : i32
    %c0_i32_2 = arith.constant 0 : i32
    return %c0_i32, %c0_i32_0, %c0_i32_1 : i32, i32, i32
  }
  func.func @transform_3(%arg0: i32, %arg1: i32, %arg2: memref<4xf32, #tpu.memory_space<smem>>) -> (i32, i32, i32) {
    %c0_i32 = arith.constant 0 : i32
    %c0_i32_0 = arith.constant 0 : i32
    %c0_i32_1 = arith.constant 0 : i32
    %c0_i32_2 = arith.constant 0 : i32
    return %c0_i32, %c0_i32_0, %c0_i32_1 : i32, i32, i32
  }
  func.func @transform_4(%arg0: i32, %arg1: i32, %arg2: memref<4xf32, #tpu.memory_space<smem>>) -> (i32, i32, i32) {
    %c0_i32 = arith.constant 0 : i32
    %c0_i32_0 = arith.constant 0 : i32
    return %arg0, %c0_i32, %arg1 : i32, i32, i32
  }
  func.func @transform_5(%arg0: i32, %arg1: i32, %arg2: memref<4xf32, #tpu.memory_space<smem>>) -> (i32, i32, i32) {
    %c0_i32 = arith.constant 0 : i32
    %c0_i32_0 = arith.constant 0 : i32
    return %arg0, %c0_i32, %arg1 : i32, i32, i32
  }
  func.func @transform_6(%arg0: i32, %arg1: i32, %arg2: memref<4xf32, #tpu.memory_space<smem>>) -> (i32, i32, i32) {
    %c0_i32 = arith.constant 0 : i32
    %c0_i32_0 = arith.constant 0 : i32
    return %arg0, %c0_i32, %arg1 : i32, i32, i32
  }
  func.func @transform_7(%arg0: i32, %arg1: i32, %arg2: memref<4xf32, #tpu.memory_space<smem>>) -> (i32, i32, i32) {
    %c0_i32 = arith.constant 0 : i32
    %c0_i32_0 = arith.constant 0 : i32
    return %arg0, %c0_i32, %arg1 : i32, i32, i32
  }
}

</mosaic_0001>

<bundles_post_ra>
// kernel: forward_attention_layer.1
= control target key start
LH: loop header
LB: loop body
LE: loop exit
PB: predicated region body
PF: predicated region fallthrough
CT: control target
= control target key end

     0   :  { %s3731_s0 = inlined_call_operand.vmem [shape: f32[4], index: 0, kind: input, shape index: {}]   ;;  %s3732_s1 = inlined_call_operand.vmem [shape: bf16[2,8,512], index: 1, kind: input, shape index: {}]   ;;  %s3733_s2 = inlined_call_operand.vmem [shape: bf16[2,8,512], index: 2, kind: input, shape index: {}]   ;;  %s3734_s3 = inlined_call_operand.vmem [shape: bf16[9,8,8], index: 3, kind: input, shape index: {}]   ;;  %s3735_s4 = inlined_call_operand.vmem [shape: bf16[9,8,8], index: 4, kind: input, shape index: {}]   ;;  %s3736_s5 = inlined_call_operand.vmem [shape: f32[2,8,384], index: 5, kind: output, shape index: {0}]   ;;  %s3737_s6 = inlined_call_operand.vmem [shape: f32[2,8,384], index: 6, kind: output, shape index: {1}]   ;;  %s3738_s7 = inlined_call_operand.vmem [shape: f32[2,8,384], index: 7, kind: output, shape index: {2}]   ;;  %s3739_s8 = inlined_call_operand.vmem [shape: f32[2,8,384], index: 8, kind: output, shape index: {3}]  }
   0x1   :  { %s14_s29 = sshll.u32 %s3731_s0, 4  ;;  %s15_s29 = int_to_ptr.vmem [resolvable:$true] %s14_s29 }
   0x2   :  { %s3071_s30 = scalar_lea.vmem %s15_s29, 16  ;;  %p3076_p1 = scmp.lt.s32.totalorder %s15_s29, %s15_s29 }
   0x3   :  { %p3072_p0 = scmp.ne.s32.totalorder %s15_s29, %s3071_s30  ;;  %p3077_p2 = scmp.lt.s32.totalorder %s3071_s30, %s3071_s30 }
   0x5   :  { %p3078_p3 = por %p3077_p2, %p3076_p1 }
   0x7   :  { %p3079_p4 = pnand %p3078_p3, %p3072_p0 }
   0x9   :  { %3082 = shalt.err (!%p3079_p4)  }
   0xa   :  { %s3109_s9 = smov [#allocation3]  }
   0xb   :  { %17 = dma.vmem_to_smem %s15_s29, 16, %s3109_s9, [#allocation2] }
   0xc   :  { %3095 = dma.done.wait [#allocation2], 16 }
   0xd   :  { %3096 = vsyncadd [#allocation2], 4294967280 }
   0xe   :  { %19 = sfence }
   0xf   :  { %s3169_s10 = smov 0   ;;  %s3171_s11 = smov 0  }
  0x10   :  { %s3173_s12 = smov 0  }
  0x11 LB: > { %s37_s0 = sadd.s32 1, %s3103_s11  ;;  %p2691_p5 = scmp.ge.s32.totalorder %s3107_s12, 1  ;;  %s3107_s12 = sphi %s3173_s12, %s25_s12   ;;  %s3103_s11 = sphi %s3171_s11, %s3741_s11   ;;  %s3099_s10 = sphi %s3169_s10, %s3740_s10  }
  0x12   : > { %p39_p6 = scmp.ge.s32.totalorder %s37_s0, 2  ;;  %p281_p7 = scmp.lt.s32.totalorder %s3107_s12, 3 }
  0x14   : > { %s3743_s0 = smov (%p39_p6, %s37_s0), 0  ;;  %p282_p8 = pnand %p2691_p5, %p281_p7 }
  0x15   : > { %p349_p9 = scmp.lt.s32.totalorder (!%p282_p8), %s3099_s10, 1  ;;  %s3113_s20 = smov (!%p282_p8), 127  }
  0x16   : > { %285 = sbr.rel (%p282_p8) target bundleno = 536 (0x218), region = 36  ;;  %s3114_s21 = smov (!%p282_p8), 126  }
  0x17   : > { %s3115_s22 = smov (!%p282_p8), 110   ;;  %s3116_s23 = smov (!%p282_p8), 109  }
  0x18   : > { %s3117_s24 = smov (!%p282_p8), 108   ;;  %s3118_s25 = smov (!%p282_p8), 92  }
  0x19   : > { %s3119_s26 = smov (!%p282_p8), 91   ;;  %s3120_s27 = smov (!%p282_p8), 90  }
  0x1a   : > { %s2780_s9 = sld [smem:[#allocation3 + $0x3]] (!%p282_p8) }
  0x1b   : > { %v3110_v0 = vmov 0.0   ;;  %s3745_s10 = smov (!%p349_p9, %s3099_s10), 1  ;;  %v3111_v1 = vmov 0   ;;  %vm3112_vm0 = vmmov 0   ;;  %vm433_vm1 = vcmask 1039360  }
  0x1c   : > { %2822 = vmatprep.subr.bf16.mxu1 %v3110_v0  ;;  %483 = vmatprep.mubr.bf16.mxu0 %v3111_v1  ;;  %s2784_s13 = sshll.u32 %s3745_s10, 4  ;;  %vm441_vm2 = vcmask 1043456   ;;  %v2700_v23 = vld [vmem:[%s3734_s3 + $0x4] sm:$0xf]  ;;  %vm437_vm3 = vcmask 64512   ;;  %vm844_vm4 = vcmask 1031168  }
  0x1d   : > { %2824 = vmatprep.mubr.msk.bf16.mxu1 %vm3112_vm0, %v3110_v0  ;;  %s353_s16 = scalar_lea.vmem %s3732_s1, %s2784_s13  ;;  %s358_s19 = scalar_lea.vmem %s3733_s2, %s2784_s13  ;;  %v411_v33 = vld [vmem:[%s3734_s3] sm:$0xf]  ;;  %v2711_v40 = vld [vmem:[%s3735_s4 + $0x4] sm:$0xf]  ;;  %vm1063_vm5 = vcmask 900096   ;;  %vm1282_vm6 = vcmask 891904  }
  0x1e   : > { %v406_v2 = vld [vmem:[%s353_s16 + $0x8] sm:$0xff]  ;;  %v405_v3 = vld [vmem:[%s353_s16] sm:$0xff]  ;;  %vm1501_vm7 = vcmask 883712   ;;  %vm1720_vm8 = vcmask 752640   ;;  %vm1939_vm9 = vcmask 744448   ;;  %vm2158_vm10 = vcmask 736256  }
  0x1f   : > { %v3197_v4 = vcombine.low %v406_v2, %v406_v2  ;;  %v3199_v5 = vcombine.low %v405_v3, %v405_v3  ;;  %v3206_v6 = vcombine.high %v406_v2, %v406_v2  ;;  %v3208_v7 = vcombine.high %v405_v3, %v405_v3  ;;  %v409_v8 = vld [vmem:[%s358_s19] sm:$0xff]  ;;  %v410_v11 = vld [vmem:[%s358_s19 + $0x8] sm:$0xff]  ;;  %s2367_s13 = sld [smem:[#allocation3]] }
  0x20   : > { %v3212_v9 = vcombine.low %v409_v8, %v409_v8  ;;  %v3214_v10 = vcombine.high %v409_v8, %v409_v8  ;;  %v3218_v12 = vcombine.low %v410_v11, %v410_v11  ;;  %v3220_v13 = vcombine.high %v410_v11, %v410_v11  ;;  %v412_v50 = vld [vmem:[%s3735_s4] sm:$0xf]  ;;  %v2722_v60 = vld [vmem:[%s3734_s3 + $0x8] sm:$0xf] }
  0x21   : > { %429 = vrot.lane.b32.xlu1 %v3197_v4, %s3113_s20  ;;  %425 = vrot.lane.b32.xlu0 %v3199_v5, %s3113_s20  ;;  %v536_v25 = vsel %vm441_vm2, %v3199_v5, 0  ;;  %v542_v27 = vsel %vm441_vm2, %v3197_v4, 0  ;;  %v2726_v8 = vld [vmem:[%s3735_s4 + $0x8] sm:$0xf] }
  0x22   : > { %v745_v41 = vsel %vm441_vm2, %v3212_v9, 0  ;;  %v751_v42 = vsel %vm441_vm2, %v3218_v12, 0 }
  0x25   : > { %431 = vrot.lane.b32.xlu1 %v3206_v6, %s3113_s20  ;;  %427 = vrot.lane.b32.xlu0 %v3208_v7, %s3113_s20  ;;  %s2781_s14 = sadd.f32 -1.0, %s2367_s13 }
  0x29   : > { %637 = vrot.lane.b32.xlu0 %v3212_v9, %s3113_s20  ;;  %639 = vrot.lane.b32.xlu1 %v3214_v10, %s3113_s20 }
  0x2d   : > { %641 = vrot.lane.b32.xlu0 %v3218_v12, %s3113_s20  ;;  %643 = vrot.lane.b32.xlu1 %v3220_v13, %s3113_s20 }
  0x31   : > { %836 = vrot.lane.b32.xlu0 %v3199_v5, %s3114_s21  ;;  %838 = vrot.lane.b32.xlu1 %v3208_v7, %s3114_s21 }
  0x35   : > { %840 = vrot.lane.b32.xlu0 %v3197_v4, %s3114_s21  ;;  %842 = vrot.lane.b32.xlu1 %v3206_v6, %s3114_s21 }
  0x39   : > { %946 = vrot.lane.b32.xlu0 %v3212_v9, %s3114_s21  ;;  %948 = vrot.lane.b32.xlu1 %v3214_v10, %s3114_s21 }
  0x3d   : > { %950 = vrot.lane.b32.xlu0 %v3218_v12, %s3114_s21  ;;  %952 = vrot.lane.b32.xlu1 %v3220_v13, %s3114_s21 }
  0x41   : > { %1055 = vrot.lane.b32.xlu0 %v3199_v5, %s3115_s22  ;;  %1057 = vrot.lane.b32.xlu1 %v3208_v7, %s3115_s22 }
  0x45   : > { %1059 = vrot.lane.b32.xlu0 %v3197_v4, %s3115_s22  ;;  %1061 = vrot.lane.b32.xlu1 %v3206_v6, %s3115_s22 }
  0x49   : > { %1165 = vrot.lane.b32.xlu0 %v3212_v9, %s3115_s22  ;;  %1167 = vrot.lane.b32.xlu1 %v3214_v10, %s3115_s22 }
  0x4d   : > { %1169 = vrot.lane.b32.xlu0 %v3218_v12, %s3115_s22  ;;  %1171 = vrot.lane.b32.xlu1 %v3220_v13, %s3115_s22 }
  0x51   : > { %1274 = vrot.lane.b32.xlu0 %v3199_v5, %s3116_s23  ;;  %1276 = vrot.lane.b32.xlu1 %v3208_v7, %s3116_s23 }
  0x55   : > { %1278 = vrot.lane.b32.xlu0 %v3197_v4, %s3116_s23  ;;  %1280 = vrot.lane.b32.xlu1 %v3206_v6, %s3116_s23 }
  0x59   : > { %1384 = vrot.lane.b32.xlu0 %v3212_v9, %s3116_s23  ;;  %1386 = vrot.lane.b32.xlu1 %v3214_v10, %s3116_s23 }
  0x5d   : > { %1388 = vrot.lane.b32.xlu0 %v3218_v12, %s3116_s23  ;;  %1390 = vrot.lane.b32.xlu1 %v3220_v13, %s3116_s23 }
  0x61   : > { %1493 = vrot.lane.b32.xlu0 %v3199_v5, %s3117_s24  ;;  %1495 = vrot.lane.b32.xlu1 %v3208_v7, %s3117_s24 }
  0x65   : > { %1497 = vrot.lane.b32.xlu0 %v3197_v4, %s3117_s24  ;;  %1499 = vrot.lane.b32.xlu1 %v3206_v6, %s3117_s24 }
  0x69   : > { %1603 = vrot.lane.b32.xlu0 %v3212_v9, %s3117_s24  ;;  %1605 = vrot.lane.b32.xlu1 %v3214_v10, %s3117_s24 }
  0x6d   : > { %1607 = vrot.lane.b32.xlu0 %v3218_v12, %s3117_s24  ;;  %1609 = vrot.lane.b32.xlu1 %v3220_v13, %s3117_s24 }
  0x71   : > { %1712 = vrot.lane.b32.xlu0 %v3199_v5, %s3118_s25  ;;  %1714 = vrot.lane.b32.xlu1 %v3208_v7, %s3118_s25 }
  0x75   : > { %1716 = vrot.lane.b32.xlu0 %v3197_v4, %s3118_s25  ;;  %1718 = vrot.lane.b32.xlu1 %v3206_v6, %s3118_s25 }
  0x79   : > { %1822 = vrot.lane.b32.xlu0 %v3212_v9, %s3118_s25  ;;  %1824 = vrot.lane.b32.xlu1 %v3214_v10, %s3118_s25 }
  0x7d   : > { %1826 = vrot.lane.b32.xlu0 %v3218_v12, %s3118_s25  ;;  %1828 = vrot.lane.b32.xlu1 %v3220_v13, %s3118_s25 }
  0x81   : > { %1931 = vrot.lane.b32.xlu0 %v3199_v5, %s3119_s26  ;;  %1933 = vrot.lane.b32.xlu1 %v3208_v7, %s3119_s26 }
  0x85   : > { %1935 = vrot.lane.b32.xlu0 %v3197_v4, %s3119_s26  ;;  %1937 = vrot.lane.b32.xlu1 %v3206_v6, %s3119_s26 }
  0x89   : > { %2041 = vrot.lane.b32.xlu0 %v3212_v9, %s3119_s26  ;;  %2043 = vrot.lane.b32.xlu1 %v3214_v10, %s3119_s26 }
  0x8d   : > { %2045 = vrot.lane.b32.xlu0 %v3218_v12, %s3119_s26  ;;  %2047 = vrot.lane.b32.xlu1 %v3220_v13, %s3119_s26  ;;  %s3586_s26 = smul.u32 24, %s3745_s10  ;;  %s2779_s10 = sld [smem:[#allocation3 + $0x2]] }
  0x8f   : > { %s387_s30 = scalar_lea.vmem %s3738_s7, %s3586_s26  ;;  %s3663_s17 = scalar_lea.vmem %s3739_s8, %s3586_s26 }
  0x90   : > { %s3669_s20 = scalar_lea.vmem %s3736_s5, %s3586_s26  ;;  %s3698_s23 = scalar_lea.vmem %s3737_s6, %s3586_s26 }
  0x91   : > { %2150 = vrot.lane.b32.xlu0 %v3199_v5, %s3120_s27  ;;  %2152 = vrot.lane.b32.xlu1 %v3208_v7, %s3120_s27 }
  0x93   : > { %v430_v14 = vpop.permute.xlu1 %429  ;;  %v426_v15 = vpop.permute.xlu0 %425 }
  0x95   : > { %2154 = vrot.lane.b32.xlu0 %v3197_v4, %s3120_s27  ;;  %2156 = vrot.lane.b32.xlu1 %v3206_v6, %s3120_s27 }
  0x97   : > { %v432_v16 = vpop.permute.xlu1 %431  ;;  %v428_v17 = vpop.permute.xlu0 %427 }
  0x98   : > { %v435_v18 = vsel %vm433_vm1, %v428_v17, %v430_v14  ;;  %v434_v19 = vsel %vm433_vm1, %v426_v15, %v428_v17  ;;  %v436_v20 = vsel %vm433_vm1, %v430_v14, %v432_v16 }
  0x99   : > { %2705 = vmatprep.subr.msk.bf16.mxu0 %vm441_vm2, %v435_v18  ;;  %v443_v21 = vsel %vm441_vm2, %v434_v19, 0  ;;  %v449_v22 = vsel %vm441_vm2, %v436_v20, 0  ;;  %2260 = vrot.lane.b32.xlu0 %v3212_v9, %s3120_s27  ;;  %v2730_v18 = vld [vmem:[%s3734_s3 + $0xc] sm:$0xf] }
  0x9a   : > { %466 = vmatpush1.bf16.msra.mxu0 %v443_v21  ;;  %2823 = vmatpush3.bf16.msra.mxu1 %v449_v22 }
  0x9b   : > { %2708 = vmatprep.subr.msk.bf16.mxu0 %vm441_vm2, %v3208_v7  ;;  %v638_v24 = vpop.permute.xlu0 %637  ;;  %2828 = vmatprep.subr.bf16.mxu1 %v3110_v0  ;;  %v640_v26 = vpop.permute.xlu1 %639 }
  0x9c   : > { %2262 = vrot.lane.b32.xlu1 %v3214_v10, %s3120_s27  ;;  %v645_v30 = vsel %vm433_vm1, %v638_v24, %v640_v26 }
  0x9d   : > { %2825 = vmatmul.mubr.msk.bf16.vlgmr.msra.gmra.mxu1 %vm437_vm3, %v2700_v23  ;;  %2706 = vmatmul.mubr.msk.bf16.vlgmr.msra.gmra.mxu0 %vm437_vm3, %v2700_v23  ;;  %v652_v34 = vsel %vm441_vm2, %v645_v30, 0 }
  0x9e   : > { %559 = vmatpush1.bf16.msra.mxu0 %v536_v25  ;;  %2829 = vmatpush3.bf16.msra.mxu1 %v542_v27 }
  0x9f   : > { %v642_v28 = vpop.permute.xlu0 %641  ;;  %v644_v29 = vpop.permute.xlu1 %643  ;;  %576 = vmatprep.mubr.bf16.mxu0 %v3111_v1  ;;  %2830 = vmatprep.mubr.msk.bf16.mxu1 %vm3112_vm0, %v3110_v0 }
  0xa0   : > { %v646_v31 = vsel %vm433_vm1, %v640_v26, %v642_v28  ;;  %v647_v32 = vsel %vm433_vm1, %v642_v28, %v644_v29  ;;  %2834 = vmatprep.subr.bf16.mxu1 %v3110_v0  ;;  %2264 = vrot.lane.b32.xlu0 %v3218_v12, %s3120_s27  ;;  %v2734_v28 = vld [vmem:[%s3735_s4 + $0xc] sm:$0xf] }
  0xa1   : > { %2716 = vmatprep.subr.msk.bf16.mxu0 %vm441_vm2, %v646_v31  ;;  %2266 = vrot.lane.b32.xlu1 %v3220_v13, %s3120_s27  ;;  %v658_v35 = vsel %vm441_vm2, %v647_v32, 0  ;;  %s2778_s27 = sld [smem:[#allocation3 + $0x1]] }
  0xa3   : > { %v837_v36 = vpop.permute.xlu0 %836  ;;  %v839_v37 = vpop.permute.xlu1 %838 }
  0xa4   : > { %v845_v48 = vsel %vm844_vm4, %v837_v36, %v839_v37 }
  0xa5   : > { %2831 = vmatmul.mubr.msk.bf16.vlgmr.msra.gmra.mxu1 %vm437_vm3, %v411_v33  ;;  %2709 = vmatmul.mubr.msk.bf16.vlgmr.msra.gmra.mxu0 %vm437_vm3, %v411_v33  ;;  %v852_v51 = vsel %vm441_vm2, %v845_v48, 0  ;;  %v2742_v48 = vld [vmem:[%s3735_s4 + $0x10] sm:$0xf] }
  0xa6   : > { %675 = vmatpush1.bf16.msra.mxu0 %v652_v34  ;;  %2835 = vmatpush3.bf16.msra.mxu1 %v658_v35 }
  0xa7   : > { %692 = vmatprep.mubr.bf16.mxu0 %v3111_v1  ;;  %2836 = vmatprep.mubr.msk.bf16.mxu1 %vm3112_vm0, %v3110_v0  ;;  %v841_v38 = vpop.permute.xlu0 %840  ;;  %v843_v39 = vpop.permute.xlu1 %842 }
  0xa8   : > { %2719 = vmatprep.subr.msk.bf16.mxu0 %vm441_vm2, %v3214_v10  ;;  %2840 = vmatprep.subr.bf16.mxu1 %v3110_v0  ;;  %v846_v45 = vsel %vm844_vm4, %v839_v37, %v841_v38  ;;  %v847_v49 = vsel %vm844_vm4, %v841_v38, %v843_v39  ;;  %v2738_v38 = vld [vmem:[%s3734_s3 + $0x10] sm:$0xf] }
  0xa9   : > { %v858_v52 = vsel %vm441_vm2, %v847_v49, 0 }
  0xab   : > { %v947_v43 = vpop.permute.xlu0 %946  ;;  %v949_v44 = vpop.permute.xlu1 %948 }
  0xac   : > { %v954_v58 = vsel %vm844_vm4, %v947_v43, %v949_v44 }
  0xad   : > { %2837 = vmatmul.mubr.msk.bf16.vlgmr.msra.gmra.mxu1 %vm437_vm3, %v2711_v40  ;;  %2717 = vmatmul.mubr.msk.bf16.vlgmr.msra.gmra.mxu0 %vm437_vm3, %v2711_v40  ;;  %v961_v61 = vsel %vm441_vm2, %v954_v58, 0  ;;  %v2746_v58 = vld [vmem:[%s3734_s3 + $0x14] sm:$0xf] }
  0xae   : > { %768 = vmatpush1.bf16.msra.mxu0 %v745_v41  ;;  %2841 = vmatpush3.bf16.msra.mxu1 %v751_v42 }
  0xaf   : > { %2723 = vmatprep.subr.msk.bf16.mxu0 %vm441_vm2, %v846_v45  ;;  %785 = vmatprep.mubr.bf16.mxu0 %v3111_v1  ;;  %v951_v46 = vpop.permute.xlu0 %950  ;;  %v953_v47 = vpop.permute.xlu1 %952 }
  0xb0   : > { %2842 = vmatprep.mubr.msk.bf16.mxu1 %vm3112_vm0, %v3110_v0  ;;  %2846 = vmatprep.subr.bf16.mxu1 %v3110_v0  ;;  %v955_v55 = vsel %vm844_vm4, %v949_v44, %v951_v46  ;;  %v956_v59 = vsel %vm844_vm4, %v951_v46, %v953_v47 }
  0xb1   : > { %v967_v62 = vsel %vm441_vm2, %v956_v59, 0 }
  0xb3   : > { %v1056_v53 = vpop.permute.xlu0 %1055  ;;  %v1058_v54 = vpop.permute.xlu1 %1057 }
  0xb4   : > { %v1064_v6 = vsel %vm1063_vm5, %v1056_v53, %v1058_v54 }
  0xb5   : > { %2843 = vmatmul.mubr.msk.bf16.vlgmr.msra.gmra.mxu1 %vm437_vm3, %v412_v50  ;;  %2720 = vmatmul.mubr.msk.bf16.vlgmr.msra.gmra.mxu0 %vm437_vm3, %v412_v50  ;;  %v1071_v9 = vsel %vm441_vm2, %v1064_v6, 0  ;;  %v2750_v6 = vld [vmem:[%s3735_s4 + $0x14] sm:$0xf] }
  0xb6   : > { %875 = vmatpush1.bf16.msra.mxu0 %v852_v51  ;;  %2847 = vmatpush3.bf16.msra.mxu1 %v858_v52 }
  0xb7   : > { %2727 = vmatprep.subr.msk.bf16.mxu0 %vm441_vm2, %v955_v55  ;;  %892 = vmatprep.mubr.bf16.mxu0 %v3111_v1  ;;  %v1060_v56 = vpop.permute.xlu0 %1059  ;;  %v1062_v57 = vpop.permute.xlu1 %1061 }
  0xb8   : > { %2848 = vmatprep.mubr.msk.bf16.mxu1 %vm3112_vm0, %v3110_v0  ;;  %2852 = vmatprep.subr.bf16.mxu1 %v3110_v0  ;;  %v1065_v3 = vsel %vm1063_vm5, %v1058_v54, %v1060_v56  ;;  %v1066_v7 = vsel %vm1063_vm5, %v1060_v56, %v1062_v57 }
  0xb9   : > { %v1077_v10 = vsel %vm441_vm2, %v1066_v7, 0 }
  0xbb   : > { %v1166_v63 = vpop.permute.xlu0 %1165  ;;  %v1168_v2 = vpop.permute.xlu1 %1167 }
  0xbc   : > { %v1173_v16 = vsel %vm1063_vm5, %v1166_v63, %v1168_v2 }
  0xbd   : > { %2849 = vmatmul.mubr.msk.bf16.vlgmr.msra.gmra.mxu1 %vm437_vm3, %v2722_v60  ;;  %2724 = vmatmul.mubr.msk.bf16.vlgmr.msra.gmra.mxu0 %vm437_vm3, %v2722_v60  ;;  %v1180_v19 = vsel %vm441_vm2, %v1173_v16, 0  ;;  %v2754_v16 = vld [vmem:[%s3734_s3 + $0x18] sm:$0xf] }
  0xbe   : > { %984 = vmatpush1.bf16.msra.mxu0 %v961_v61  ;;  %2853 = vmatpush3.bf16.msra.mxu1 %v967_v62 }
  0xbf   : > { %2731 = vmatprep.subr.msk.bf16.mxu0 %vm441_vm2, %v1065_v3  ;;  %1001 = vmatprep.mubr.bf16.mxu0 %v3111_v1  ;;  %v1170_v4 = vpop.permute.xlu0 %1169  ;;  %v1172_v5 = vpop.permute.xlu1 %1171 }
  0xc0   : > { %2854 = vmatprep.mubr.msk.bf16.mxu1 %vm3112_vm0, %v3110_v0  ;;  %2858 = vmatprep.subr.bf16.mxu1 %v3110_v0  ;;  %v1174_v13 = vsel %vm1063_vm5, %v1168_v2, %v1170_v4  ;;  %v1175_v17 = vsel %vm1063_vm5, %v1170_v4, %v1172_v5 }
  0xc1   : > { %v1186_v20 = vsel %vm441_vm2, %v1175_v17, 0 }
  0xc3   : > { %v1275_v11 = vpop.permute.xlu0 %1274  ;;  %v1277_v12 = vpop.permute.xlu1 %1276 }
  0xc4   : > { %v1283_v26 = vsel %vm1282_vm6, %v1275_v11, %v1277_v12 }
  0xc5   : > { %2855 = vmatmul.mubr.msk.bf16.vlgmr.msra.gmra.mxu1 %vm437_vm3, %v2726_v8  ;;  %2728 = vmatmul.mubr.msk.bf16.vlgmr.msra.gmra.mxu0 %vm437_vm3, %v2726_v8  ;;  %v1290_v29 = vsel %vm441_vm2, %v1283_v26, 0  ;;  %v2758_v26 = vld [vmem:[%s3735_s4 + $0x18] sm:$0xf] }
  0xc6   : > { %1094 = vmatpush1.bf16.msra.mxu0 %v1071_v9  ;;  %2859 = vmatpush3.bf16.msra.mxu1 %v1077_v10 }
  0xc7   : > { %2735 = vmatprep.subr.msk.bf16.mxu0 %vm441_vm2, %v1174_v13  ;;  %1111 = vmatprep.mubr.bf16.mxu0 %v3111_v1  ;;  %v1279_v14 = vpop.permute.xlu0 %1278  ;;  %v1281_v15 = vpop.permute.xlu1 %1280 }
  0xc8   : > { %2860 = vmatprep.mubr.msk.bf16.mxu1 %vm3112_vm0, %v3110_v0  ;;  %2864 = vmatprep.subr.bf16.mxu1 %v3110_v0  ;;  %v1284_v23 = vsel %vm1282_vm6, %v1277_v12, %v1279_v14  ;;  %v1285_v27 = vsel %vm1282_vm6, %v1279_v14, %v1281_v15 }
  0xc9   : > { %v1296_v30 = vsel %vm441_vm2, %v1285_v27, 0 }
  0xcb   : > { %v1385_v21 = vpop.permute.xlu0 %1384  ;;  %v1387_v22 = vpop.permute.xlu1 %1386 }
  0xcc   : > { %v1392_v36 = vsel %vm1282_vm6, %v1385_v21, %v1387_v22 }
  0xcd   : > { %2861 = vmatmul.mubr.msk.bf16.vlgmr.msra.gmra.mxu1 %vm437_vm3, %v2730_v18  ;;  %2732 = vmatmul.mubr.msk.bf16.vlgmr.msra.gmra.mxu0 %vm437_vm3, %v2730_v18  ;;  %v1399_v39 = vsel %vm441_vm2, %v1392_v36, 0  ;;  %v2762_v36 = vld [vmem:[%s3734_s3 + $0x1c] sm:$0xf] }
  0xce   : > { %1203 = vmatpush1.bf16.msra.mxu0 %v1180_v19  ;;  %2865 = vmatpush3.bf16.msra.mxu1 %v1186_v20 }
  0xcf   : > { %2739 = vmatprep.subr.msk.bf16.mxu0 %vm441_vm2, %v1284_v23  ;;  %1220 = vmatprep.mubr.bf16.mxu0 %v3111_v1  ;;  %v1389_v24 = vpop.permute.xlu0 %1388  ;;  %v1391_v25 = vpop.permute.xlu1 %1390 }
  0xd0   : > { %2866 = vmatprep.mubr.msk.bf16.mxu1 %vm3112_vm0, %v3110_v0  ;;  %2870 = vmatprep.subr.bf16.mxu1 %v3110_v0  ;;  %v1393_v33 = vsel %vm1282_vm6, %v1387_v22, %v1389_v24  ;;  %v1394_v37 = vsel %vm1282_vm6, %v1389_v24, %v1391_v25 }
  0xd1   : > { %v1405_v40 = vsel %vm441_vm2, %v1394_v37, 0 }
  0xd3   : > { %v1494_v31 = vpop.permute.xlu0 %1493  ;;  %v1496_v32 = vpop.permute.xlu1 %1495 }
  0xd4   : > { %v1502_v46 = vsel %vm1501_vm7, %v1494_v31, %v1496_v32 }
  0xd5   : > { %2867 = vmatmul.mubr.msk.bf16.vlgmr.msra.gmra.mxu1 %vm437_vm3, %v2734_v28  ;;  %2736 = vmatmul.mubr.msk.bf16.vlgmr.msra.gmra.mxu0 %vm437_vm3, %v2734_v28  ;;  %v1509_v49 = vsel %vm441_vm2, %v1502_v46, 0 }
  0xd6   : > { %1313 = vmatpush1.bf16.msra.mxu0 %v1290_v29  ;;  %2871 = vmatpush3.bf16.msra.mxu1 %v1296_v30 }
  0xd7   : > { %2743 = vmatprep.subr.msk.bf16.mxu0 %vm441_vm2, %v1393_v33  ;;  %1330 = vmatprep.mubr.bf16.mxu0 %v3111_v1  ;;  %v1498_v34 = vpop.permute.xlu0 %1497  ;;  %v1500_v35 = vpop.permute.xlu1 %1499 }
  0xd8   : > { %2872 = vmatprep.mubr.msk.bf16.mxu1 %vm3112_vm0, %v3110_v0  ;;  %2876 = vmatprep.subr.bf16.mxu1 %v3110_v0  ;;  %v1503_v43 = vsel %vm1501_vm7, %v1496_v32, %v1498_v34  ;;  %v1504_v47 = vsel %vm1501_vm7, %v1498_v34, %v1500_v35 }
  0xd9   : > { %v1515_v50 = vsel %vm441_vm2, %v1504_v47, 0 }
  0xdb   : > { %v1604_v41 = vpop.permute.xlu0 %1603  ;;  %v1606_v42 = vpop.permute.xlu1 %1605 }
  0xdc   : > { %v1611_v56 = vsel %vm1501_vm7, %v1604_v41, %v1606_v42 }
  0xdd   : > { %2873 = vmatmul.mubr.msk.bf16.vlgmr.msra.gmra.mxu1 %vm437_vm3, %v2738_v38  ;;  %2740 = vmatmul.mubr.msk.bf16.vlgmr.msra.gmra.mxu0 %vm437_vm3, %v2738_v38  ;;  %v1618_v59 = vsel %vm441_vm2, %v1611_v56, 0 }
  0xde   : > { %1422 = vmatpush1.bf16.msra.mxu0 %v1399_v39  ;;  %2877 = vmatpush3.bf16.msra.mxu1 %v1405_v40 }
  0xdf   : > { %2747 = vmatprep.subr.msk.bf16.mxu0 %vm441_vm2, %v1503_v43  ;;  %1439 = vmatprep.mubr.bf16.mxu0 %v3111_v1  ;;  %v1608_v44 = vpop.permute.xlu0 %1607  ;;  %v1610_v45 = vpop.permute.xlu1 %1609 }
  0xe0   : > { %2878 = vmatprep.mubr.msk.bf16.mxu1 %vm3112_vm0, %v3110_v0  ;;  %2882 = vmatprep.subr.bf16.mxu1 %v3110_v0  ;;  %v1612_v53 = vsel %vm1501_vm7, %v1606_v42, %v1608_v44  ;;  %v1613_v57 = vsel %vm1501_vm7, %v1608_v44, %v1610_v45  ;;  %v2766_v44 = vld [vmem:[%s3735_s4 + $0x1c] sm:$0xf] }
  0xe1   : > { %v1624_v60 = vsel %vm441_vm2, %v1613_v57, 0 }
  0xe3   : > { %v1713_v51 = vpop.permute.xlu0 %1712  ;;  %v1715_v52 = vpop.permute.xlu1 %1714 }
  0xe4   : > { %v1721_v4 = vsel %vm1720_vm8, %v1713_v51, %v1715_v52 }
  0xe5   : > { %2879 = vmatmul.mubr.msk.bf16.vlgmr.msra.gmra.mxu1 %vm437_vm3, %v2742_v48  ;;  %2744 = vmatmul.mubr.msk.bf16.vlgmr.msra.gmra.mxu0 %vm437_vm3, %v2742_v48  ;;  %v1728_v7 = vsel %vm441_vm2, %v1721_v4, 0 }
  0xe6   : > { %1532 = vmatpush1.bf16.msra.mxu0 %v1509_v49  ;;  %2883 = vmatpush3.bf16.msra.mxu1 %v1515_v50 }
  0xe7   : > { %2751 = vmatprep.subr.msk.bf16.mxu0 %vm441_vm2, %v1612_v53  ;;  %1549 = vmatprep.mubr.bf16.mxu0 %v3111_v1  ;;  %v1717_v54 = vpop.permute.xlu0 %1716  ;;  %v1719_v55 = vpop.permute.xlu1 %1718 }
  0xe8   : > { %2884 = vmatprep.mubr.msk.bf16.mxu1 %vm3112_vm0, %v3110_v0  ;;  %2888 = vmatprep.subr.bf16.mxu1 %v3110_v0  ;;  %v1722_v63 = vsel %vm1720_vm8, %v1715_v52, %v1717_v54  ;;  %v1723_v5 = vsel %vm1720_vm8, %v1717_v54, %v1719_v55  ;;  %v2770_v52 = vld [vmem:[%s3734_s3 + $0x20] sm:$0xf] }
  0xe9   : > { %v1734_v8 = vsel %vm441_vm2, %v1723_v5, 0  ;;  %v2774_v55 = vld [vmem:[%s3735_s4 + $0x20] sm:$0xf] }
  0xeb   : > { %v1823_v61 = vpop.permute.xlu0 %1822  ;;  %v1825_v62 = vpop.permute.xlu1 %1824 }
  0xec   : > { %v1830_v14 = vsel %vm1720_vm8, %v1823_v61, %v1825_v62 }
  0xed   : > { %2885 = vmatmul.mubr.msk.bf16.vlgmr.msra.gmra.mxu1 %vm437_vm3, %v2746_v58  ;;  %2748 = vmatmul.mubr.msk.bf16.vlgmr.msra.gmra.mxu0 %vm437_vm3, %v2746_v58  ;;  %v1837_v17 = vsel %vm441_vm2, %v1830_v14, 0 }
  0xee   : > { %1641 = vmatpush1.bf16.msra.mxu0 %v1618_v59  ;;  %2889 = vmatpush3.bf16.msra.mxu1 %v1624_v60 }
  0xef   : > { %2755 = vmatprep.subr.msk.bf16.mxu0 %vm441_vm2, %v1722_v63  ;;  %1658 = vmatprep.mubr.bf16.mxu0 %v3111_v1  ;;  %v1827_v2 = vpop.permute.xlu0 %1826  ;;  %v1829_v3 = vpop.permute.xlu1 %1828 }
  0xf0   : > { %2890 = vmatprep.mubr.msk.bf16.mxu1 %vm3112_vm0, %v3110_v0  ;;  %2894 = vmatprep.subr.bf16.mxu1 %v3110_v0  ;;  %v1831_v11 = vsel %vm1720_vm8, %v1825_v62, %v1827_v2  ;;  %v1832_v15 = vsel %vm1720_vm8, %v1827_v2, %v1829_v3 }
  0xf1   : > { %v1843_v18 = vsel %vm441_vm2, %v1832_v15, 0 }
  0xf3   : > { %v1932_v9 = vpop.permute.xlu0 %1931  ;;  %v1934_v10 = vpop.permute.xlu1 %1933 }
  0xf4   : > { %v1940_v24 = vsel %vm1939_vm9, %v1932_v9, %v1934_v10 }
  0xf5   : > { %2891 = vmatmul.mubr.msk.bf16.vlgmr.msra.gmra.mxu1 %vm437_vm3, %v2750_v6  ;;  %2752 = vmatmul.mubr.msk.bf16.vlgmr.msra.gmra.mxu0 %vm437_vm3, %v2750_v6  ;;  %v1947_v27 = vsel %vm441_vm2, %v1940_v24, 0 }
  0xf6   : > { %1751 = vmatpush1.bf16.msra.mxu0 %v1728_v7  ;;  %2895 = vmatpush3.bf16.msra.mxu1 %v1734_v8 }
  0xf7   : > { %2759 = vmatprep.subr.msk.bf16.mxu0 %vm441_vm2, %v1831_v11  ;;  %1768 = vmatprep.mubr.bf16.mxu0 %v3111_v1  ;;  %v1936_v12 = vpop.permute.xlu0 %1935  ;;  %v1938_v13 = vpop.permute.xlu1 %1937 }
  0xf8   : > { %2896 = vmatprep.mubr.msk.bf16.mxu1 %vm3112_vm0, %v3110_v0  ;;  %2900 = vmatprep.subr.bf16.mxu1 %v3110_v0  ;;  %v1941_v21 = vsel %vm1939_vm9, %v1934_v10, %v1936_v12  ;;  %v1942_v25 = vsel %vm1939_vm9, %v1936_v12, %v1938_v13 }
  0xf9   : > { %v1953_v28 = vsel %vm441_vm2, %v1942_v25, 0 }
  0xfb   : > { %v2042_v19 = vpop.permute.xlu0 %2041  ;;  %v2044_v20 = vpop.permute.xlu1 %2043 }
  0xfc   : > { %v2049_v33 = vsel %vm1939_vm9, %v2042_v19, %v2044_v20 }
  0xfd   : > { %2897 = vmatmul.mubr.msk.bf16.vlgmr.msra.gmra.mxu1 %vm437_vm3, %v2754_v16  ;;  %2756 = vmatmul.mubr.msk.bf16.vlgmr.msra.gmra.mxu0 %vm437_vm3, %v2754_v16  ;;  %v2056_v37 = vsel %vm441_vm2, %v2049_v33, 0 }
  0xfe   : > { %1860 = vmatpush1.bf16.msra.mxu0 %v1837_v17  ;;  %2901 = vmatpush3.bf16.msra.mxu1 %v1843_v18 }
  0xff   : > { %2763 = vmatprep.subr.msk.bf16.mxu0 %vm441_vm2, %v1941_v21  ;;  %1877 = vmatprep.mubr.bf16.mxu0 %v3111_v1  ;;  %v2046_v22 = vpop.permute.xlu0 %2045  ;;  %v2048_v23 = vpop.permute.xlu1 %2047 }
 0x100   : > { %2902 = vmatprep.mubr.msk.bf16.mxu1 %vm3112_vm0, %v3110_v0  ;;  %2906 = vmatprep.subr.bf16.mxu1 %v3110_v0  ;;  %v2050_v31 = vsel %vm1939_vm9, %v2044_v20, %v2046_v22  ;;  %v2051_v34 = vsel %vm1939_vm9, %v2046_v22, %v2048_v23 }
 0x101   : > { %v2062_v38 = vsel %vm441_vm2, %v2051_v34, 0 }
 0x103   : > { %v2151_v29 = vpop.permute.xlu0 %2150  ;;  %v2153_v30 = vpop.permute.xlu1 %2152 }
 0x104   : > { %v2159_v42 = vsel %vm2158_vm10, %v2151_v29, %v2153_v30 }
 0x105   : > { %2903 = vmatmul.mubr.msk.bf16.vlgmr.msra.gmra.mxu1 %vm437_vm3, %v2758_v26  ;;  %2760 = vmatmul.mubr.msk.bf16.vlgmr.msra.gmra.mxu0 %vm437_vm3, %v2758_v26  ;;  %v2166_v46 = vsel %vm441_vm2, %v2159_v42, 0 }
 0x106   : > { %1970 = vmatpush1.bf16.msra.mxu0 %v1947_v27  ;;  %2907 = vmatpush3.bf16.msra.mxu1 %v1953_v28 }
 0x107   : > { %2767 = vmatprep.subr.msk.bf16.mxu0 %vm441_vm2, %v2050_v31  ;;  %1987 = vmatprep.mubr.bf16.mxu0 %v3111_v1  ;;  %v2155_v32 = vpop.permute.xlu0 %2154  ;;  %v2157_v35 = vpop.permute.xlu1 %2156 }
 0x108   : > { %2908 = vmatprep.mubr.msk.bf16.mxu1 %vm3112_vm0, %v3110_v0  ;;  %2912 = vmatprep.subr.bf16.mxu1 %v3110_v0  ;;  %v2160_v39 = vsel %vm2158_vm10, %v2153_v30, %v2155_v32  ;;  %v2161_v43 = vsel %vm2158_vm10, %v2155_v32, %v2157_v35 }
 0x109   : > { %v2172_v47 = vsel %vm441_vm2, %v2161_v43, 0 }
 0x10b   : > { %v2261_v40 = vpop.permute.xlu0 %2260 }
 0x10d   : > { %2909 = vmatmul.mubr.msk.bf16.vlgmr.msra.gmra.mxu1 %vm437_vm3, %v2762_v36  ;;  %2764 = vmatmul.mubr.msk.bf16.vlgmr.msra.gmra.mxu0 %vm437_vm3, %v2762_v36 }
 0x10e   : > { %2079 = vmatpush1.bf16.msra.mxu0 %v2056_v37  ;;  %2913 = vmatpush3.bf16.msra.mxu1 %v2062_v38  ;;  %v2263_v41 = vpop.permute.xlu1 %2262 }
 0x10f   : > { %2771 = vmatprep.subr.msk.bf16.mxu0 %vm441_vm2, %v2160_v39  ;;  %2096 = vmatprep.mubr.bf16.mxu0 %v3111_v1  ;;  %v2268_v50 = vsel %vm2158_vm10, %v2261_v40, %v2263_v41 }
 0x110   : > { %2914 = vmatprep.mubr.msk.bf16.mxu1 %vm3112_vm0, %v3110_v0  ;;  %2918 = vmatprep.subr.bf16.mxu1 %v3110_v0  ;;  %v2275_v53 = vsel %vm441_vm2, %v2268_v50, 0 }
 0x112   : > { %v2265_v45 = vpop.permute.xlu0 %2264 }
 0x113   : > { %v2269_v48 = vsel %vm2158_vm10, %v2263_v41, %v2265_v45  ;;  %v2267_v49 = vpop.permute.xlu1 %2266 }
 0x114   : > { %v2270_v51 = vsel %vm2158_vm10, %v2265_v45, %v2267_v49 }
 0x115   : > { %2915 = vmatmul.mubr.msk.bf16.vlgmr.msra.gmra.mxu1 %vm437_vm3, %v2766_v44  ;;  %2768 = vmatmul.mubr.msk.bf16.vlgmr.msra.gmra.mxu0 %vm437_vm3, %v2766_v44  ;;  %v2281_v54 = vsel %vm441_vm2, %v2270_v51, 0 }
 0x116   : > { %2189 = vmatpush1.bf16.msra.mxu0 %v2166_v46  ;;  %2919 = vmatpush3.bf16.msra.mxu1 %v2172_v47 }
 0x117   : > { %2775 = vmatprep.subr.msk.bf16.mxu0 %vm441_vm2, %v2269_v48  ;;  %2206 = vmatprep.mubr.bf16.mxu0 %v3111_v1 }
 0x118   : > { %2920 = vmatprep.mubr.msk.bf16.mxu1 %vm3112_vm0, %v3110_v0  ;;  %2924 = vmatprep.subr.bf16.mxu1 %v3110_v0 }
 0x11d   : > { %2772 = vmatmul.mubr.msk.bf16.vlgmr.msra.gmra.mxu0 %vm437_vm3, %v2770_v52  ;;  %2921 = vmatmul.mubr.msk.bf16.vlgmr.msra.gmra.mxu1 %vm437_vm3, %v2770_v52 }
 0x11e   : > { %2298 = vmatpush1.bf16.msra.mxu0 %v2275_v53  ;;  %2925 = vmatpush3.bf16.msra.mxu1 %v2281_v54 }
 0x11f   : > { %2315 = vmatprep.mubr.bf16.mxu0 %v3111_v1  ;;  %2926 = vmatprep.mubr.msk.bf16.mxu1 %vm3112_vm0, %v3110_v0 }
 0x125   : > { %2776 = vmatmul.mubr.msk.bf16.vlgmr.msra.gmra.mxu0 %vm437_vm3, %v2774_v55  ;;  %2927 = vmatmul.mubr.msk.bf16.vlgmr.msra.gmra.mxu1 %vm437_vm3, %v2774_v55 }
 0x15d   : > { %v485_v56 = vpop.f32.mrf.mxu0  ;;  %v526_v57 = vpop.f32.mrf.mxu1 }
 0x15f   : > { %v487_v58 = vpop.f32.mrf.mxu0  ;;  %v2826_v59 = vpop.f32.mrf.mxu1 }
 0x161   : > { %v489_v60 = vpop.f32.mrf.mxu0  ;;  %v529_v61 = vpop.f32.mrf.mxu1 }
 0x163   : > { %v490_v62 = vpop.f32.mrf.mxu0  ;;  %v2827_v63 = vpop.f32.mrf.mxu1 }
 0x165   : > { %v578_v1 = vpop.f32.mrf.mxu0  ;;  %v619_v2 = vpop.f32.mrf.mxu1 }
 0x166   : > { %v579_v3 = vadd.f32 %v578_v1, %v485_v56  ;;  %v620_v0 = vadd.f32 %v619_v2, %v526_v57 }
 0x167   : > { %v580_v4 = vpop.f32.mrf.mxu0  ;;  %v2832_v5 = vpop.f32.mrf.mxu1 }
 0x168   : > { %v581_v6 = vadd.f32 %v580_v4, %v487_v58 }
 0x169   : > { %v582_v7 = vpop.f32.mrf.mxu0  ;;  %v622_v8 = vpop.f32.mrf.mxu1 }
 0x16b   : > { %v583_v9 = vpop.f32.mrf.mxu0  ;;  %v2833_v10 = vpop.f32.mrf.mxu1 }
 0x16d   : > { %v694_v11 = vpop.f32.mrf.mxu0  ;;  %v735_v12 = vpop.f32.mrf.mxu1 }
 0x16f   : > { %v696_v13 = vpop.f32.mrf.mxu0  ;;  %v2838_v14 = vpop.f32.mrf.mxu1 }
 0x171   : > { %v698_v15 = vpop.f32.mrf.mxu0  ;;  %v738_v16 = vpop.f32.mrf.mxu1 }
 0x173   : > { %v699_v17 = vpop.f32.mrf.mxu0  ;;  %v2839_v18 = vpop.f32.mrf.mxu1 }
 0x175   : > { %v787_v19 = vpop.f32.mrf.mxu0  ;;  %v828_v20 = vpop.f32.mrf.mxu1 }
 0x176   : > { %v788_v21 = vadd.f32 %v787_v19, %v694_v11  ;;  %v829_v22 = vadd.f32 %v828_v20, %v735_v12 }
 0x177   : > { %v789_v23 = vpop.f32.mrf.mxu0  ;;  %v2844_v24 = vpop.f32.mrf.mxu1 }
 0x178   : > { %v790_v25 = vadd.f32 %v789_v23, %v696_v13 }
 0x179   : > { %v791_v26 = vpop.f32.mrf.mxu0  ;;  %v831_v27 = vpop.f32.mrf.mxu1 }
 0x17b   : > { %v792_v28 = vpop.f32.mrf.mxu0  ;;  %v2845_v29 = vpop.f32.mrf.mxu1 }
 0x17d   : > { %v894_v30 = vpop.f32.mrf.mxu0  ;;  %v935_v31 = vpop.f32.mrf.mxu1 }
 0x17e   : > { %v941_v32 = vadd.f32 %v894_v30, %v579_v3  ;;  %v943_v33 = vadd.f32 %v935_v31, %v620_v0 }
 0x17f   : > { %v896_v34 = vpop.f32.mrf.mxu0  ;;  %v2850_v35 = vpop.f32.mrf.mxu1 }
 0x180   : > { %v942_v36 = vadd.f32 %v896_v34, %v581_v6 }
 0x181   : > { %v898_v37 = vpop.f32.mrf.mxu0  ;;  %v938_v38 = vpop.f32.mrf.mxu1 }
 0x183   : > { %v899_v39 = vpop.f32.mrf.mxu0  ;;  %v2851_v40 = vpop.f32.mrf.mxu1 }
 0x185   : > { %v1003_v41 = vpop.f32.mrf.mxu0  ;;  %v1044_v42 = vpop.f32.mrf.mxu1 }
 0x186   : > { %v1050_v43 = vadd.f32 %v1003_v41, %v788_v21  ;;  %v1052_v44 = vadd.f32 %v1044_v42, %v829_v22 }
 0x187   : > { %v1005_v45 = vpop.f32.mrf.mxu0  ;;  %v2856_v46 = vpop.f32.mrf.mxu1 }
 0x188   : > { %v1051_v47 = vadd.f32 %v1005_v45, %v790_v25 }
 0x189   : > { %v1007_v48 = vpop.f32.mrf.mxu0  ;;  %v1047_v49 = vpop.f32.mrf.mxu1 }
 0x18b   : > { %v1008_v50 = vpop.f32.mrf.mxu0  ;;  %v2857_v51 = vpop.f32.mrf.mxu1 }
 0x18d   : > { %v1113_v52 = vpop.f32.mrf.mxu0  ;;  %v1154_v53 = vpop.f32.mrf.mxu1 }
 0x18e   : > { %v3554_v54 = vadd.f32 %v1113_v52, %v941_v32  ;;  %v3556_v55 = vadd.f32 %v1154_v53, %v943_v33 }
 0x18f   : > { %v1115_v56 = vpop.f32.mrf.mxu0  ;;  %v2862_v57 = vpop.f32.mrf.mxu1 }
 0x190   : > { %v3558_v58 = vadd.f32 %v1115_v56, %v942_v36 }
 0x191   : > { %v1117_v59 = vpop.f32.mrf.mxu0  ;;  %v1157_v60 = vpop.f32.mrf.mxu1 }
 0x193   : > { %v1118_v61 = vpop.f32.mrf.mxu0  ;;  %v2863_v62 = vpop.f32.mrf.mxu1 }
 0x195   : > { %v1222_v63 = vpop.f32.mrf.mxu0  ;;  %v1263_v1 = vpop.f32.mrf.mxu1 }
 0x196   : > { %v3560_v2 = vadd.f32 %v1222_v63, %v1050_v43  ;;  %v3562_v3 = vadd.f32 %v1263_v1, %v1052_v44 }
 0x197   : > { %v1224_v0 = vpop.f32.mrf.mxu0  ;;  %v2868_v4 = vpop.f32.mrf.mxu1 }
 0x198   : > { %v3564_v5 = vadd.f32 %v1224_v0, %v1051_v47 }
 0x199   : > { %v1226_v6 = vpop.f32.mrf.mxu0  ;;  %v1266_v7 = vpop.f32.mrf.mxu1 }
 0x19b   : > { %v1227_v8 = vpop.f32.mrf.mxu0  ;;  %v2869_v9 = vpop.f32.mrf.mxu1 }
 0x19d   : > { %v1332_v10 = vpop.f32.mrf.mxu0  ;;  %v1373_v11 = vpop.f32.mrf.mxu1 }
 0x19f   : > { %v1334_v12 = vpop.f32.mrf.mxu0  ;;  %v2874_v13 = vpop.f32.mrf.mxu1 }
 0x1a0   : > { %v1379_v13 = vadd.f32 %v1332_v10, %v3554_v54 }
 0x1a1   : > { %v1336_v14 = vpop.f32.mrf.mxu0  ;;  %v1376_v15 = vpop.f32.mrf.mxu1 }
 0x1a2   : > { %v1381_v14 = vadd.f32 %v1373_v11, %v3556_v55 }
 0x1a3   : > { %v1337_v16 = vpop.f32.mrf.mxu0  ;;  %v2875_v17 = vpop.f32.mrf.mxu1 }
 0x1a4   : > { %v1380_v17 = vadd.f32 %v1334_v12, %v3558_v58 }
 0x1a5   : > { %v3566_v18 = vpop.f32.mrf.mxu0  ;;  %v3568_v19 = vpop.f32.mrf.mxu1 }
 0x1a6   : > { %v1488_v11 = vadd.f32 %v3566_v18, %v3560_v2 }
 0x1a7   : > { %v3570_v20 = vpop.f32.mrf.mxu0  ;;  %v2880_v21 = vpop.f32.mrf.mxu1 }
 0x1a9   : > { %v1445_v22 = vpop.f32.mrf.mxu0  ;;  %v1485_v23 = vpop.f32.mrf.mxu1 }
 0x1ab   : > { %v1446_v24 = vpop.f32.mrf.mxu0  ;;  %v2881_v25 = vpop.f32.mrf.mxu1 }
 0x1ad   : > { %v1551_v26 = vpop.f32.mrf.mxu0  ;;  %v1592_v27 = vpop.f32.mrf.mxu1 }
 0x1ae   : > { %v1598_v21 = vadd.f32 %v1551_v26, %v1379_v13  ;;  %v1600_v22 = vadd.f32 %v1592_v27, %v1381_v14  ;;  %v1490_v26 = vadd.f32 %v3568_v19, %v3562_v3 }
 0x1af   : > { %v1553_v28 = vpop.f32.mrf.mxu0  ;;  %v2886_v29 = vpop.f32.mrf.mxu1 }
 0x1b0   : > { %v1599_v25 = vadd.f32 %v1553_v28, %v1380_v17 }
 0x1b1   : > { %v1555_v30 = vpop.f32.mrf.mxu0  ;;  %v1595_v31 = vpop.f32.mrf.mxu1 }
 0x1b3   : > { %v1556_v32 = vpop.f32.mrf.mxu0  ;;  %v2887_v33 = vpop.f32.mrf.mxu1 }
 0x1b5   : > { %v3572_v34 = vpop.f32.mrf.mxu0  ;;  %v3574_v35 = vpop.f32.mrf.mxu1 }
 0x1b6   : > { %v1707_v2 = vadd.f32 %v3572_v34, %v1488_v11  ;;  %v1709_v18 = vadd.f32 %v3574_v35, %v1490_v26  ;;  %v1489_v34 = vadd.f32 %v3570_v20, %v3564_v5  ;;  %v2403_v11 = vstv %s2781_s14 }
 0x1b7   : > { %v3576_v36 = vpop.f32.mrf.mxu0  ;;  %v2892_v37 = vpop.f32.mrf.mxu1 }
 0x1b9   : > { %v1664_v38 = vpop.f32.mrf.mxu0  ;;  %v1704_v39 = vpop.f32.mrf.mxu1 }
 0x1bb   : > { %v1665_v40 = vpop.f32.mrf.mxu0  ;;  %v2893_v41 = vpop.f32.mrf.mxu1 }
 0x1bd   : > { %v1770_v42 = vpop.f32.mrf.mxu0  ;;  %v1811_v43 = vpop.f32.mrf.mxu1 }
 0x1be   : > { %v1817_v29 = vadd.f32 %v1770_v42, %v1598_v21  ;;  %v1819_v30 = vadd.f32 %v1811_v43, %v1600_v22 }
 0x1bf   : > { %v1772_v44 = vpop.f32.mrf.mxu0  ;;  %v2898_v45 = vpop.f32.mrf.mxu1 }
 0x1c0   : > { %v1818_v54 = vadd.f32 %v1772_v44, %v1599_v25 }
 0x1c1   : > { %v1774_v46 = vpop.f32.mrf.mxu0  ;;  %v1814_v47 = vpop.f32.mrf.mxu1 }
 0x1c2   : > { %v3609_v46 = vstv %s2778_s27 }
 0x1c3   : > { %v1775_v48 = vpop.f32.mrf.mxu0  ;;  %v2899_v49 = vpop.f32.mrf.mxu1 }
 0x1c4   : > { %v2381_v49 = vstv %s2779_s10 }
 0x1c5   : > { %v1879_v50 = vpop.f32.mrf.mxu0  ;;  %v1920_v51 = vpop.f32.mrf.mxu1 }
 0x1c6   : > { %v1926_v19 = vadd.f32 %v1879_v50, %v1707_v2  ;;  %v1928_v41 = vadd.f32 %v1920_v51, %v1709_v18  ;;  %v1708_v50 = vadd.f32 %v3576_v36, %v1489_v34 }
 0x1c7   : > { %v3578_v52 = vpop.f32.mrf.mxu0  ;;  %v2904_v53 = vpop.f32.mrf.mxu1 }
 0x1c8   : > { %v2382_v53 = vstv %s2780_s9 }
 0x1c9   : > { %v1883_v56 = vpop.f32.mrf.mxu0  ;;  %v1923_v57 = vpop.f32.mrf.mxu1 }
 0x1cb   : > { %v1884_v59 = vpop.f32.mrf.mxu0  ;;  %v2905_v60 = vpop.f32.mrf.mxu1 }
 0x1cc   : > { %v1927_v59 = vadd.f32 %v3578_v52, %v1708_v50 }
 0x1cd   : > { %v1989_v61 = vpop.f32.mrf.mxu0  ;;  %v2030_v62 = vpop.f32.mrf.mxu1 }
 0x1ce   : > { %v2036_v10 = vadd.f32 %v1989_v61, %v1817_v29  ;;  %v2038_v55 = vadd.f32 %v2030_v62, %v1819_v30 }
 0x1cf   : > { %v1991_v63 = vpop.f32.mrf.mxu0  ;;  %v2910_v1 = vpop.f32.mrf.mxu1 }
 0x1d0   : > { %v2037_v27 = vadd.f32 %v1991_v63, %v1818_v54 }
 0x1d1   : > { %v1993_v0 = vpop.f32.mrf.mxu0  ;;  %v2033_v4 = vpop.f32.mrf.mxu1 }
 0x1d3   : > { %v1994_v6 = vpop.f32.mrf.mxu0  ;;  %v2911_v7 = vpop.f32.mrf.mxu1 }
 0x1d5   : > { %v2098_v8 = vpop.f32.mrf.mxu0  ;;  %v2139_v9 = vpop.f32.mrf.mxu1 }
 0x1d6   : > { %v2145_v44 = vadd.f32 %v2098_v8, %v1926_v19  ;;  %v2147_v45 = vadd.f32 %v2139_v9, %v1928_v41 }
 0x1d7   : > { %v3582_v15 = vpop.f32.mrf.mxu0  ;;  %v2916_v16 = vpop.f32.mrf.mxu1 }
 0x1d8   : > { %v2146_v4 = vadd.f32 %v3582_v15, %v1927_v59 }
 0x1d9   : > { %v2102_v23 = vpop.f32.mrf.mxu0  ;;  %v2142_v24 = vpop.f32.mrf.mxu1 }
 0x1db   : > { %v2103_v31 = vpop.f32.mrf.mxu0  ;;  %v2917_v32 = vpop.f32.mrf.mxu1 }
 0x1dd   : > { %v2208_v58 = vpop.f32.mrf.mxu0  ;;  %v2249_v12 = vpop.f32.mrf.mxu1 }
 0x1de   : > { %v3596_v28 = vadd.f32 %v2208_v58, %v2036_v10  ;;  %v3598_v33 = vadd.f32 %v2249_v12, %v2038_v55  ;;  %v2398_v12 = vstv %s2367_s13 }
 0x1df   : > { %v2210_v37 = vpop.f32.mrf.mxu0  ;;  %v2922_v38 = vpop.f32.mrf.mxu1 }
 0x1e0   : > { %2434 = vst [vmem:[%s387_s30] sm:$0xff] %v3596_v28  ;;  %2436 = vst [vmem:[%s387_s30 + $0x10] sm:$0xff] %v3598_v33  ;;  %v3604_v39 = vadd.f32 %v2210_v37, %v2037_v27 }
 0x1e1   : > { %v2212_v40 = vpop.f32.mrf.mxu0  ;;  %v2252_v3 = vpop.f32.mrf.mxu1 }
 0x1e2   : > { %2435 = vst [vmem:[%s387_s30 + $0x8] sm:$0xff] %v3604_v39 }
 0x1e3   : > { %v2213_v42 = vpop.f32.mrf.mxu0  ;;  %v2923_v43 = vpop.f32.mrf.mxu1 }
 0x1e5   : > { %v2317_v35 = vpop.f32.mrf.mxu0  ;;  %v2358_v47 = vpop.f32.mrf.mxu1 }
 0x1e6   : > { %v3611_v48 = vadd.f32 %v2317_v35, %v2145_v44  ;;  %v3613_v56 = vadd.f32 %v2358_v47, %v2147_v45 }
 0x1e7   : > { %v2319_v51 = vpop.f32.mrf.mxu0  ;;  %v2928_v57 = vpop.f32.mrf.mxu1 }
 0x1e8   : > { %vm2372_vm11 = vcmp.lt.f32.partialorder %v3611_v48, %v3609_v46  ;;  %v2375_v5 = vsub.f32 %v3611_v48, %v3609_v46  ;;  %v3621_v20 = vmax.f32 %v3611_v48, 1e-30  ;;  %vm2374_vm12 = vcmp.lt.f32.partialorder %v3613_v56, %v3609_v46 }
 0x1e9   : > { %v2383_v60 = vsel %vm2372_vm11, %v2381_v49, %v2382_v53  ;;  %v2377_v36 = vsub.f32 %v3613_v56, %v3609_v46  ;;  %v2321_v61 = vpop.f32.mrf.mxu0  ;;  %v2361_v62 = vpop.f32.mrf.mxu1  ;;  %v2385_v9 = vsel %vm2374_vm12, %v2381_v49, %v2382_v53  ;;  %v3639_v14 = vmax.f32 %v3613_v56, 1e-30 }
 0x1ea   : > { %v2378_v63 = vmul.f32 %v2375_v5, %v2375_v5  ;;  %v2386_v1 = vsub.f32 0.0, %v2383_v60  ;;  %v2935_v0 = vand.u32 2147483647, %v3621_v20  ;;  %v2388_v13 = vsub.f32 0.0, %v2385_v9 }
 0x1eb   : > { %v2380_v6 = vmul.f32 %v2377_v36, %v2377_v36  ;;  %v2322_v52 = vpop.f32.mrf.mxu0  ;;  %v2929_v7 = vpop.f32.mrf.mxu1  ;;  %v3641_v16 = vadd.f32 %v2319_v51, %v2146_v4  ;;  %v2987_v21 = vand.u32 2147483647, %v3639_v14  ;;  %vm2939_vm14 = vcmp.lt.f32.partialorder %v3621_v20, 0 }
 0x1ec   : > { %v2389_v8 = vmul.f32 %v2386_v1, %v2378_v63  ;;  %3053 = vlog2.f32 %v2935_v0  ;;  %vm2940_vm15 = vcmp.eq.f32.partialorder %v3621_v20, 0  ;;  %vm2944_vm0 = vcmp.eq.f32.partialorder %v2935_v0, 2139095040 }
 0x1ed   : > { %v2391_v15 = vmul.f32 %v2388_v13, %v2380_v6  ;;  %vm2373_vm13 = vcmp.lt.f32.partialorder %v3641_v16, %v3609_v46  ;;  %v2376_v23 = vsub.f32 %v3641_v16, %v3609_v46  ;;  %v3654_v25 = vmax.f32 %v3641_v16, 1e-30 }
 0x1ee   : > { %v2392_v17 = vmul.f32 1.442695, %v2389_v8  ;;  %v2384_v24 = vsel %vm2373_vm13, %v2381_v49, %v2382_v53  ;;  %vm2952_vm1 = vcmp.ne.f32.partialorder %v3621_v20, %v3621_v20  ;;  %vm2941_vm2 = vcmp.eq.f32.partialorder %v3621_v20, 1065353216 }
 0x1ef   : > { %v2396_v22 = vmul.f32 1.442695, %v2391_v15  ;;  %v2379_v29 = vmul.f32 %v2376_v23, %v2376_v23  ;;  %v2387_v30 = vsub.f32 0.0, %v2384_v24  ;;  %v2961_v31 = vand.u32 2147483647, %v3654_v25 }
 0x1f0   : > { %3055 = vpow2.f32 %v2392_v17  ;;  %vm2419_vm3 = vcmp.gt.f32.partialorder %v3611_v48, 0.0  ;;  %vm2991_vm4 = vcmp.lt.f32.partialorder %v3639_v14, 0  ;;  %vm2992_vm5 = vcmp.eq.f32.partialorder %v3639_v14, 0 }
 0x1f1   : > { %3057 = vlog2.f32 %v2987_v21  ;;  %v2390_v32 = vmul.f32 %v2387_v30, %v2379_v29  ;;  %vm2996_vm6 = vcmp.eq.f32.partialorder %v2987_v21, 2139095040  ;;  %vm3004_vm7 = vcmp.ne.f32.partialorder %v3639_v14, %v3639_v14 }
 0x1f2   : > { %3059 = vpow2.f32 %v2396_v22  ;;  %vm2993_vm8 = vcmp.eq.f32.partialorder %v3639_v14, 1065353216  ;;  %vm2421_vm9 = vcmp.gt.f32.partialorder %v3613_v56, 0.0  ;;  %vm2965_vm10 = vcmp.lt.f32.partialorder %v3654_v25, 0 }
 0x1f3   : > { %3061 = vlog2.f32 %v2961_v31  ;;  %v2394_v54 = vmul.f32 1.442695, %v2390_v32 }
 0x1f5   : > { %3063 = vpow2.f32 %v2394_v54 }
 0x1f9   : > { %v3054_v10 = vpop.eup %3053 }
 0x1fa   : > { %v2937_v55 = vmul.f32 0.8, %v3054_v10 }
 0x1fc   : > { %3065 = vpow2.f32 %v2937_v55 }
 0x1fd   : > { %v3056_v58 = vpop.eup %3055 }
 0x1fe   : > { %v3058_v26 = vpop.eup %3057  ;;  %v2404_v27 = vmul.f32 %v3056_v58, %v2403_v11  ;;  %v2399_v2 = vmul.f32 %v3056_v58, %v2398_v12 }
 0x1ff   : > { %v2989_v37 = vmul.f32 0.8, %v3058_v26  ;;  %v3060_v38 = vpop.eup %3059 }
 0x200   : > { %v2407_v18 = vadd.f32 1.0, %v2404_v27  ;;  %v2406_v40 = vmul.f32 %v3060_v38, %v2403_v11  ;;  %v3062_v19 = vpop.eup %3061  ;;  %v2401_v42 = vmul.f32 %v3060_v38, %v2398_v12 }
 0x201   : > { %3067 = vpow2.f32 %v2989_v37  ;;  %v2963_v44 = vmul.f32 0.8, %v3062_v19 }
 0x202   : > { %v2410_v3 = vsel %vm2372_vm11, %v2399_v2, %v2407_v18  ;;  %v2409_v43 = vadd.f32 1.0, %v2406_v40  ;;  %v3064_v34 = vpop.eup %3063  ;;  %vm2966_vm11 = vcmp.eq.f32.partialorder %v3654_v25, 0 }
 0x203   : > { %v2413_v41 = vmul.f32 %v2410_v3, %v3596_v28  ;;  %2437 = vst [vmem:[%s3663_s17] sm:$0xff] %v2410_v3  ;;  %3069 = vpow2.f32 %v2963_v44  ;;  %v2405_v47 = vmul.f32 %v3064_v34, %v2403_v11  ;;  %v2400_v28 = vmul.f32 %v3064_v34, %v2398_v12 }
 0x204   : > { %v2412_v45 = vsel %vm2374_vm12, %v2401_v42, %v2409_v43  ;;  %vm2970_vm12 = vcmp.eq.f32.partialorder %v2961_v31, 2139095040 }
 0x205   : > { %2416 = vst [vmem:[%s3669_s20] sm:$0xff] %v2413_v41  ;;  %v2415_v35 = vmul.f32 %v2412_v45, %v3598_v33  ;;  %2439 = vst [vmem:[%s3663_s17 + $0x10] sm:$0xff] %v2412_v45  ;;  %v2408_v53 = vadd.f32 1.0, %v2405_v47 }
 0x207   : > { %2418 = vst [vmem:[%s3669_s20 + $0x10] sm:$0xff] %v2415_v35  ;;  %v2411_v33 = vsel %vm2373_vm13, %v2400_v28, %v2408_v53  ;;  %vm2978_vm13 = vcmp.ne.f32.partialorder %v3654_v25, %v3654_v25 }
 0x208   : > { %v2414_v5 = vmul.f32 %v2411_v33, %v3604_v39  ;;  %2438 = vst [vmem:[%s3663_s17 + $0x8] sm:$0xff] %v2411_v33 }
 0x209   : > { %v3066_v49 = vpop.eup %3065 }
 0x20a   : > { %v2945_v50 = vsel %vm2939_vm14, 2143289344, %v3066_v49  ;;  %2417 = vst [vmem:[%s3669_s20 + $0x8] sm:$0xff] %v2414_v5  ;;  %vm2967_vm14 = vcmp.eq.f32.partialorder %v3654_v25, 1065353216 }
 0x20b   : > { %v2946_v51 = vsel %vm2940_vm15, 0, %v2945_v50  ;;  %vm2420_vm15 = vcmp.gt.f32.partialorder %v3641_v16, 0.0 }
 0x20c   : > { %v2951_v57 = vsel %vm2944_vm0, 2139095040, %v2946_v51 }
 0x20d   : > { %v2955_v59 = vsel %vm2952_vm1, 2143289344, %v2951_v57 }
 0x20e   : > { %v3068_v60 = vpop.eup %3067  ;;  %v2956_v46 = vsel %vm2941_vm2, 1065353216, %v2955_v59 }
 0x20f   : > { %v2428_v36 = vsel %vm2419_vm3, %v2956_v46, 0.0  ;;  %v2997_v39 = vsel %vm2991_vm4, 2143289344, %v3068_v60 }
 0x210   : > { %2431 = vst [vmem:[%s3698_s23] sm:$0xff] %v2428_v36  ;;  %v2998_v61 = vsel %vm2992_vm5, 0, %v2997_v39  ;;  %v3070_v20 = vpop.eup %3069 }
 0x211   : > { %v3003_v62 = vsel %vm2996_vm6, 2139095040, %v2998_v61  ;;  %v2971_v0 = vsel %vm2965_vm10, 2143289344, %v3070_v20 }
 0x212   : > { %v3007_v48 = vsel %vm3004_vm7, 2143289344, %v3003_v62  ;;  %v2972_v4 = vsel %vm2966_vm11, 0, %v2971_v0 }
 0x213   : > { %v3008_v63 = vsel %vm2993_vm8, 1065353216, %v3007_v48  ;;  %v2977_v6 = vsel %vm2970_vm12, 2139095040, %v2972_v4 }
 0x214   : > { %v2430_v1 = vsel %vm2421_vm9, %v3008_v63, 0.0  ;;  %v2981_v56 = vsel %vm2978_vm13, 2143289344, %v2977_v6 }
 0x215   : > { %2433 = vst [vmem:[%s3698_s23 + $0x10] sm:$0xff] %v2430_v1  ;;  %v2982_v52 = vsel %vm2967_vm14, 1065353216, %v2981_v56 }
 0x216   : > { %v2429_v7 = vsel %vm2420_vm15, %v2982_v52, 0.0 }
 0x217   : > { %2432 = vst [vmem:[%s3698_s23 + $0x8] sm:$0xff] %v2429_v7 }
 0x218 PF: > { %s25_s12 = sadd.s32 1, %s3107_s12   ;;  %s3740_s10 = smov %s3103_s11 }
 0x219   : > { %p22_p10 = scmp.ge.s32.totalorder %s25_s12, 4   ;;  %s3741_s11 = smov %s3743_s0 }
 0x21b   :  { %24 = sbr.rel (!%p22_p10) target bundleno = 17 (0x11), region = 123 }

</bundles_post_ra>
